<compile_context>
chip_gen: v6e
topology: v6e:2x2x1
jax: 0.10.0
libtpu: 0.0.40
codegen_flags: <defaults>
</compile_context>

<pallas_src>
import jax
import jax.numpy as jnp
from jax.experimental import pallas as pl
from jax.experimental.pallas import tpu as pltpu

# ---- small synthetic dims (stand-in for tf_efficientnet_b7_ns, in_chans=2) ----
N, C_IN, H, W = 2, 2, 16, 16
C_STEM = 16            # stem output channels
C_MID = 64             # MBConv expanded channels
C_SE = 8               # SE bottleneck channels
C_FEAT = 128           # "n_features" fed to self.fc (2560 in the real B7)
HO, WO = H // 2, W // 2
HW = HO * WO
CP = 128               # lane-padded channel width used for every in-kernel tensor


def _silu(v):
    return v * jax.nn.sigmoid(v)


# ------------------------------ fused kernel ----------------------------------

def fused_forward_kernel(x_ref, stem_w_ref, mm_w_ref, dw_w_ref, b_ref,
                         o_ref, xpad_ref, midpad_ref):
    """One batch sample per grid step; everything lives in VMEM."""
    f32, bf16 = jnp.float32, jnp.bfloat16

    # ---- stem: 3x3 / stride-2 / pad-1 conv (BN folded) + SiLU ----------------
    # in-kernel halo: zero the padded scratch, drop the tile in the interior,
    # read the 9 stride-2 taps with strided pl.ds slices, accumulate on MXU.
    xpad_ref[...] = jnp.zeros_like(xpad_ref)
    xpad_ref[:, 1:H + 1, 1:W + 1, :] = x_ref[...]
    stem = jnp.zeros((HW, CP), f32)
    for k in range(9):
        ki, kj = k // 3, k % 3
        tap = xpad_ref[:, pl.ds(ki, HO, stride=2), pl.ds(kj, WO, stride=2), :]
        stem = stem + jnp.dot(tap.reshape(HW, CP).astype(bf16), stem_w_ref[k],
                              preferred_element_type=f32)
    stem = _silu(stem + b_ref[0:1, :])                              # (HW, CP) f32

    # ---- MBConv expand 1x1 + SiLU -------------------------------------------
    mid = _silu(jnp.dot(stem.astype(bf16), mm_w_ref[0],
                        preferred_element_type=f32) + b_ref[1:2, :])

    # ---- depthwise 3x3 / stride-1 / pad-1 + SiLU (VPU, f32) ------------------
    midpad_ref[...] = jnp.zeros_like(midpad_ref)
    midpad_ref[:, 1:HO + 1, 1:WO + 1, :] = mid.reshape(1, HO, WO, CP)
    dww = dw_w_ref[...]                                             # (9, CP) f32
    acc = jnp.zeros((1, HO, WO, CP), f32)
    for k in range(9):
        ki, kj = k // 3, k % 3
        acc = acc + midpad_ref[:, ki:ki + HO, kj:kj + WO, :] * dww[k:k + 1, :]
    dw = _silu(acc + b_ref[2:3, :]).reshape(HW, CP)

    # ---- squeeze-excite: GAP -> fc+SiLU -> fc+sigmoid -> channel scale -------
    pooled = jnp.sum(dw, axis=0, keepdims=True) * (1.0 / HW)        # (1, CP)
    se = _silu(jnp.dot(pooled.astype(bf16), mm_w_ref[1],
                       preferred_element_type=f32) + b_ref[3:4, :])
    gate = jax.nn.sigmoid(jnp.dot(se.astype(bf16), mm_w_ref[2],
                                  preferred_element_type=f32) + b_ref[4:5, :])
    dw = dw * gate                                                  # (HW, CP)

    # ---- project 1x1 + residual ----------------------------------------------
    proj = (jnp.dot(dw.astype(bf16), mm_w_ref[3], preferred_element_type=f32)
            + b_ref[5:6, :] + stem)

    # ---- head 1x1 + SiLU, global average pool, fc(n_features, 1) fused -------
    head = _silu(jnp.dot(proj.astype(bf16), mm_w_ref[4],
                         preferred_element_type=f32) + b_ref[6:7, :])
    feat = jnp.sum(head, axis=0, keepdims=True) * (1.0 / HW)        # (1, CP)
    out = jnp.dot(feat.astype(bf16), mm_w_ref[5],
                  preferred_element_type=f32) + b_ref[7:8, :]       # (1, CP)

    # lane/sublane-dense store; the wrapper reads column 0 of sublane 0.
    o_ref[...] = jnp.broadcast_to(out.reshape(1, 1, CP), o_ref.shape).astype(o_ref.dtype)


# ------------------------------ wrapper ----------------------------------------

def forward(kparams, x_nchw):
    # NCHW -> NHWC + zero-pad channels to 128 lanes (layout plumbing only).
    x = jnp.transpose(x_nchw, (0, 2, 3, 1)).astype(jnp.float32)
    x = jnp.pad(x, ((0, 0), (0, 0), (0, 0), (0, CP - C_IN)))

    out = pl.pallas_call(
        fused_forward_kernel,
        out_shape=jax.ShapeDtypeStruct((N, 8, CP), jnp.float32),
        grid_spec=pltpu.PrefetchScalarGridSpec(
            num_scalar_prefetch=0,
            grid=(N,),                                        # one sample per step
            in_specs=[
                pl.BlockSpec((1, H, W, CP), lambda n: (n, 0, 0, 0)),   # x
                pl.BlockSpec((9, CP, CP), lambda n: (0, 0, 0)),        # stem taps
                pl.BlockSpec((6, CP, CP), lambda n: (0, 0, 0)),        # 1x1 / fc mats
                pl.BlockSpec((9, CP), lambda n: (0, 0)),               # dw weights
                pl.BlockSpec((8, CP), lambda n: (0, 0)),               # biases
            ],
            out_specs=pl.BlockSpec((1, 8, CP), lambda n: (n, 0, 0)),
            scratch_shapes=[
                pltpu.VMEM((1, H + 2, W + 2, CP), jnp.float32),    # stem halo
                pltpu.VMEM((1, HO + 2, WO + 2, CP), jnp.float32),  # dwconv halo
            ],
        ),
        compiler_params=pltpu.CompilerParams(
            dimension_semantics=("parallel",)),               # megacore on v7x
    )(x, kparams["stem_w_p"], kparams["mm_w_p"], kparams["dw_w_p"], kparams["bias_p"])
    return out[:, 0, :1]                                      # (N, 1)


# ------------------------------ parameters --------------------------------------

def init_params(key):
    ks = jax.random.split(key, 16)
    wmat = lambda k, shape, fan_in: jax.random.normal(k, shape, jnp.float32) / jnp.sqrt(fan_in)
    bias = lambda k, n: 0.01 * jax.random.normal(k, (n,), jnp.float32)
    return {
        # BN folded into conv weights; biases are the folded BN shifts.
        "stem_w": wmat(ks[0], (3, 3, C_IN, C_STEM), 9 * C_IN),
        "stem_b": bias(ks[1], C_STEM),
        "exp_w": wmat(ks[2], (C_STEM, C_MID), C_STEM),
        "exp_b": bias(ks[3], C_MID),
        "dw_w": wmat(ks[4], (3, 3, C_MID), 9),
        "dw_b": bias(ks[5], C_MID),
        "se_w1": wmat(ks[6], (C_MID, C_SE), C_MID),
        "se_b1": bias(ks[7], C_SE),
        "se_w2": wmat(ks[8], (C_SE, C_MID), C_SE),
        "se_b2": bias(ks[9], C_MID),
        "proj_w": wmat(ks[10], (C_MID, C_STEM), C_MID),
        "proj_b": bias(ks[11], C_STEM),
        "head_w": wmat(ks[12], (C_STEM, C_FEAT), C_STEM),
        "head_b": bias(ks[13], C_FEAT),
        "fc_w": wmat(ks[14], (C_FEAT, 1), C_FEAT),    # self.fc = nn.Linear(n_features, 1)
        "fc_b": bias(ks[15], 1),
    }


def pack_params(p):
    """Zero-pad weights to lane-dense (..,128) tiles; bf16 for MXU operands."""
    def pad_mat(w):
        return jnp.zeros((CP, CP), jnp.float32).at[: w.shape[0], : w.shape[1]].set(w)

    def pad_vec(v):
        return jnp.zeros((CP,), jnp.float32).at[: v.shape[0]].set(v)

    stem_w = jnp.stack([pad_mat(p["stem_w"][ki, kj])
                        for ki in range(3) for kj in range(3)])            # (9,CP,CP)
    mm_w = jnp.stack([pad_mat(p[k]) for k in
                      ("exp_w", "se_w1", "se_w2", "proj_w", "head_w", "fc_w")])
    dw_w = jnp.zeros((9, CP), jnp.float32).at[:, :C_MID].set(p["dw_w"].reshape(9, C_MID))
    biases = jnp.stack([pad_vec(p[k]) for k in
                        ("stem_b", "exp_b", "dw_b", "se_b1", "se_b2",
                         "proj_b", "head_b", "fc_b")])
    return {
        "stem_w_p": stem_w.astype(jnp.bfloat16),    # MXU operands in bf16
        "mm_w_p": mm_w.astype(jnp.bfloat16),
        "dw_w_p": dw_w,                             # VPU path stays f32 (v5e)
        "bias_p": biases,
    }


# ------------------------------ pure-JAX reference -------------------------------

def forward_ref(params, x_nchw):
    """Same math (bf16 matmul operands, f32 accumulation) for correctness check."""
    p = params
    f32, bf16 = jnp.float32, jnp.bfloat16
    mm = lambda a, w: jnp.dot(a.astype(bf16), w.astype(bf16), preferred_element_type=f32)
    silu = lambda v: v * jax.nn.sigmoid(v)

    x = jnp.transpose(x_nchw, (0, 2, 3, 1)).astype(f32)
    xp = jnp.pad(x, ((0, 0), (1, 1), (1, 1), (0, 0)))
    acc = jnp.zeros((N, HO, WO, C_STEM), f32)
    for ki in range(3):
        for kj in range(3):
            tap = xp[:, ki:ki + 2 * HO:2, kj:kj + 2 * WO:2, :]
            acc = acc + mm(tap.reshape(-1, C_IN), p["stem_w"][ki, kj]).reshape(N, HO, WO, C_STEM)
    stem = silu(acc + p["stem_b"]).reshape(N * HW, C_STEM)

    mid = silu(mm(stem, p["exp_w"]) + p["exp_b"]).reshape(N, HO, WO, C_MID)
    mp = jnp.pad(mid, ((0, 0), (1, 1), (1, 1), (0, 0)))
    acc = jnp.zeros((N, HO, WO, C_MID), f32)
    for ki in range(3):
        for kj in range(3):
            acc = acc + mp[:, ki:ki + HO, kj:kj + WO, :] * p["dw_w"][ki, kj]
    dw = silu(acc + p["dw_b"]).reshape(N, HW, C_MID)

    pooled = jnp.mean(dw, axis=1)
    se = silu(mm(pooled, p["se_w1"]) + p["se_b1"])
    gate = jax.nn.sigmoid(mm(se, p["se_w2"]) + p["se_b2"])
    dws = (dw * gate[:, None, :]).reshape(N * HW, C_MID)

    proj = mm(dws, p["proj_w"]) + p["proj_b"] + stem
    head = silu(mm(proj, p["head_w"]) + p["head_b"])
    feat = jnp.mean(head.reshape(N, HW, C_FEAT), axis=1)
    return mm(feat, p["fc_w"]) + p["fc_b"]


if __name__ == "__main__":
    key = jax.random.PRNGKey(0)
    kx, kp = jax.random.split(key)
    x = jax.random.normal(kx, (N, C_IN, H, W), jnp.float32)   # in_chans=2, NCHW
    params = init_params(kp)
    kparams = pack_params(params)

    out = jax.block_until_ready(jax.jit(forward)(kparams, x))
    ref = forward_ref(params, x)
    assert out.shape == (N, 1), out.shape
    assert jnp.allclose(out, ref, atol=1e-2, rtol=1e-2), (out, ref)
    print("KERNEL_OK")
</pallas_src>

<mosaic_0001>
module attributes {stable_mosaic.version = 11 : i64} {
  func.func @fused_forward_kernel(%arg0: i32, %arg1: memref<1x16x16x128xf32, #tpu.memory_space<vmem>>, %arg2: memref<9x128x128xbf16, #tpu.memory_space<vmem>>, %arg3: memref<6x128x128xbf16, #tpu.memory_space<vmem>>, %arg4: memref<9x128xf32, #tpu.memory_space<vmem>>, %arg5: memref<8x128xf32, #tpu.memory_space<vmem>>, %arg6: memref<1x8x128xf32, #tpu.memory_space<vmem>>, %arg7: memref<1x18x18x128xf32, #tpu.memory_space<vmem>>, %arg8: memref<1x10x10x128xf32, #tpu.memory_space<vmem>>) attributes {dimension_semantics = [#tpu.dimension_semantics<parallel>], iteration_bounds = array<i64: 2>, scalar_prefetch = 0 : i64, scratch_operands = 2 : i64, tpu.core_type = #tpu.core_type<tc>, window_params = [{transform_indices = @transform_0, window_bounds = array<i64: 1, 16, 16, 128>}, {pipeline_mode = #tpu.pipeline_mode<synchronous>, transform_indices = @transform_1, window_bounds = array<i64: 9, 128, 128>}, {pipeline_mode = #tpu.pipeline_mode<synchronous>, transform_indices = @transform_2, window_bounds = array<i64: 6, 128, 128>}, {pipeline_mode = #tpu.pipeline_mode<synchronous>, transform_indices = @transform_3, window_bounds = array<i64: 9, 128>}, {pipeline_mode = #tpu.pipeline_mode<synchronous>, transform_indices = @transform_4, window_bounds = array<i64: 8, 128>}, {transform_indices = @transform_5, window_bounds = array<i64: 1, 8, 128>}]} {
    %cst = arith.constant 0.000000e+00 : f32
    %0 = vector.broadcast %cst : f32 to vector<1x18x18x128xf32>
    %c0 = arith.constant 0 : index
    %c0_0 = arith.constant 0 : index
    %c0_1 = arith.constant 0 : index
    %c0_2 = arith.constant 0 : index
    %1 = vector.load %arg7[%c0, %c0_0, %c0_1, %c0_2] : memref<1x18x18x128xf32, #tpu.memory_space<vmem>>, vector<1x18x18x128xf32>
    tpu.vector_store %arg7[%c0, %c0_0, %c0_1, %c0_2], %0 {strides = array<i32>} : memref<1x18x18x128xf32, #tpu.memory_space<vmem>>, vector<1x18x18x128xf32>,
    %c0_3 = arith.constant 0 : index
    %c0_4 = arith.constant 0 : index
    %c0_5 = arith.constant 0 : index
    %c0_6 = arith.constant 0 : index
    %2 = vector.load %arg1[%c0_3, %c0_4, %c0_5, %c0_6] : memref<1x16x16x128xf32, #tpu.memory_space<vmem>>, vector<1x16x16x128xf32>
    %c0_7 = arith.constant 0 : index
    %c1 = arith.constant 1 : index
    %c1_8 = arith.constant 1 : index
    %c0_9 = arith.constant 0 : index
    %3 = vector.load %arg7[%c0_7, %c1, %c1_8, %c0_9] : memref<1x18x18x128xf32, #tpu.memory_space<vmem>>, vector<1x16x16x128xf32>
    tpu.vector_store %arg7[%c0_7, %c1, %c1_8, %c0_9], %2 {strides = array<i32>} : memref<1x18x18x128xf32, #tpu.memory_space<vmem>>, vector<1x16x16x128xf32>,
    %cst_10 = arith.constant 0.000000e+00 : f32
    %4 = vector.broadcast %cst_10 : f32 to vector<64x128xf32>
    %c0_11 = arith.constant 0 : index
    %c0_12 = arith.constant 0 : index
    %c0_13 = arith.constant 0 : index
    %c0_14 = arith.constant 0 : index
    %5 = tpu.strided_load %arg7[%c0_11, %c0_12, %c0_13, %c0_14] {strides = array<i32: 1, 2, 2, 1>} : memref<1x18x18x128xf32, #tpu.memory_space<vmem>>, vector<1x8x8x128xf32>
    %6 = vector.shape_cast %5 : vector<1x8x8x128xf32> to vector<64x128xf32>
    %7 = arith.truncf %6 : vector<64x128xf32> to vector<64x128xbf16>
    %c0_15 = arith.constant 0 : index
    %c0_16 = arith.constant 0 : index
    %c0_17 = arith.constant 0 : index
    %8 = vector.load %arg2[%c0_15, %c0_16, %c0_17] : memref<9x128x128xbf16, #tpu.memory_space<vmem>>, vector<1x128x128xbf16>
    %9 = vector.shape_cast %8 : vector<1x128x128xbf16> to vector<128x128xbf16>
    %cst_18 = arith.constant dense<0.000000e+00> : vector<64x128xf32>
    %10 = tpu.matmul %7, %9, %cst_18 {dimension_numbers = #tpu.dot_dimension_numbers<[1], [0], [0], [1], [0, 0, 1, 1], [], []>} : vector<64x128xbf16>, vector<128x128xbf16>, vector<64x128xf32> -> vector<64x128xf32>
    %11 = arith.addf %4, %10 : vector<64x128xf32>
    %c0_19 = arith.constant 0 : index
    %c0_20 = arith.constant 0 : index
    %c1_21 = arith.constant 1 : index
    %c0_22 = arith.constant 0 : index
    %12 = tpu.strided_load %arg7[%c0_19, %c0_20, %c1_21, %c0_22] {strides = array<i32: 1, 2, 2, 1>} : memref<1x18x18x128xf32, #tpu.memory_space<vmem>>, vector<1x8x8x128xf32>
    %13 = vector.shape_cast %12 : vector<1x8x8x128xf32> to vector<64x128xf32>
    %14 = arith.truncf %13 : vector<64x128xf32> to vector<64x128xbf16>
    %c1_23 = arith.constant 1 : index
    %c0_24 = arith.constant 0 : index
    %c0_25 = arith.constant 0 : index
    %15 = vector.load %arg2[%c1_23, %c0_24, %c0_25] : memref<9x128x128xbf16, #tpu.memory_space<vmem>>, vector<1x128x128xbf16>
    %16 = vector.shape_cast %15 : vector<1x128x128xbf16> to vector<128x128xbf16>
    %cst_26 = arith.constant dense<0.000000e+00> : vector<64x128xf32>
    %17 = tpu.matmul %14, %16, %cst_26 {dimension_numbers = #tpu.dot_dimension_numbers<[1], [0], [0], [1], [0, 0, 1, 1], [], []>} : vector<64x128xbf16>, vector<128x128xbf16>, vector<64x128xf32> -> vector<64x128xf32>
    %18 = arith.addf %11, %17 : vector<64x128xf32>
    %c0_27 = arith.constant 0 : index
    %c0_28 = arith.constant 0 : index
    %c2 = arith.constant 2 : index
    %c0_29 = arith.constant 0 : index
    %19 = tpu.strided_load %arg7[%c0_27, %c0_28, %c2, %c0_29] {strides = array<i32: 1, 2, 2, 1>} : memref<1x18x18x128xf32, #tpu.memory_space<vmem>>, vector<1x8x8x128xf32>
    %20 = vector.shape_cast %19 : vector<1x8x8x128xf32> to vector<64x128xf32>
    %21 = arith.truncf %20 : vector<64x128xf32> to vector<64x128xbf16>
    %c2_30 = arith.constant 2 : index
    %c0_31 = arith.constant 0 : index
    %c0_32 = arith.constant 0 : index
    %22 = vector.load %arg2[%c2_30, %c0_31, %c0_32] : memref<9x128x128xbf16, #tpu.memory_space<vmem>>, vector<1x128x128xbf16>
    %23 = vector.shape_cast %22 : vector<1x128x128xbf16> to vector<128x128xbf16>
    %cst_33 = arith.constant dense<0.000000e+00> : vector<64x128xf32>
    %24 = tpu.matmul %21, %23, %cst_33 {dimension_numbers = #tpu.dot_dimension_numbers<[1], [0], [0], [1], [0, 0, 1, 1], [], []>} : vector<64x128xbf16>, vector<128x128xbf16>, vector<64x128xf32> -> vector<64x128xf32>
    %25 = arith.addf %18, %24 : vector<64x128xf32>
    %c0_34 = arith.constant 0 : index
    %c1_35 = arith.constant 1 : index
    %c0_36 = arith.constant 0 : index
    %c0_37 = arith.constant 0 : index
    %26 = tpu.strided_load %arg7[%c0_34, %c1_35, %c0_36, %c0_37] {strides = array<i32: 1, 2, 2, 1>} : memref<1x18x18x128xf32, #tpu.memory_space<vmem>>, vector<1x8x8x128xf32>
    %27 = vector.shape_cast %26 : vector<1x8x8x128xf32> to vector<64x128xf32>
    %28 = arith.truncf %27 : vector<64x128xf32> to vector<64x128xbf16>
    %c3 = arith.constant 3 : index
    %c0_38 = arith.constant 0 : index
    %c0_39 = arith.constant 0 : index
    %29 = vector.load %arg2[%c3, %c0_38, %c0_39] : memref<9x128x128xbf16, #tpu.memory_space<vmem>>, vector<1x128x128xbf16>
    %30 = vector.shape_cast %29 : vector<1x128x128xbf16> to vector<128x128xbf16>
    %cst_40 = arith.constant dense<0.000000e+00> : vector<64x128xf32>
    %31 = tpu.matmul %28, %30, %cst_40 {dimension_numbers = #tpu.dot_dimension_numbers<[1], [0], [0], [1], [0, 0, 1, 1], [], []>} : vector<64x128xbf16>, vector<128x128xbf16>, vector<64x128xf32> -> vector<64x128xf32>
    %32 = arith.addf %25, %31 : vector<64x128xf32>
    %c0_41 = arith.constant 0 : index
    %c1_42 = arith.constant 1 : index
    %c1_43 = arith.constant 1 : index
    %c0_44 = arith.constant 0 : index
    %33 = tpu.strided_load %arg7[%c0_41, %c1_42, %c1_43, %c0_44] {strides = array<i32: 1, 2, 2, 1>} : memref<1x18x18x128xf32, #tpu.memory_space<vmem>>, vector<1x8x8x128xf32>
    %34 = vector.shape_cast %33 : vector<1x8x8x128xf32> to vector<64x128xf32>
    %35 = arith.truncf %34 : vector<64x128xf32> to vector<64x128xbf16>
    %c4 = arith.constant 4 : index
    %c0_45 = arith.constant 0 : index
    %c0_46 = arith.constant 0 : index
    %36 = vector.load %arg2[%c4, %c0_45, %c0_46] : memref<9x128x128xbf16, #tpu.memory_space<vmem>>, vector<1x128x128xbf16>
    %37 = vector.shape_cast %36 : vector<1x128x128xbf16> to vector<128x128xbf16>
    %cst_47 = arith.constant dense<0.000000e+00> : vector<64x128xf32>
    %38 = tpu.matmul %35, %37, %cst_47 {dimension_numbers = #tpu.dot_dimension_numbers<[1], [0], [0], [1], [0, 0, 1, 1], [], []>} : vector<64x128xbf16>, vector<128x128xbf16>, vector<64x128xf32> -> vector<64x128xf32>
    %39 = arith.addf %32, %38 : vector<64x128xf32>
    %c0_48 = arith.constant 0 : index
    %c1_49 = arith.constant 1 : index
    %c2_50 = arith.constant 2 : index
    %c0_51 = arith.constant 0 : index
    %40 = tpu.strided_load %arg7[%c0_48, %c1_49, %c2_50, %c0_51] {strides = array<i32: 1, 2, 2, 1>} : memref<1x18x18x128xf32, #tpu.memory_space<vmem>>, vector<1x8x8x128xf32>
    %41 = vector.shape_cast %40 : vector<1x8x8x128xf32> to vector<64x128xf32>
    %42 = arith.truncf %41 : vector<64x128xf32> to vector<64x128xbf16>
    %c5 = arith.constant 5 : index
    %c0_52 = arith.constant 0 : index
    %c0_53 = arith.constant 0 : index
    %43 = vector.load %arg2[%c5, %c0_52, %c0_53] : memref<9x128x128xbf16, #tpu.memory_space<vmem>>, vector<1x128x128xbf16>
    %44 = vector.shape_cast %43 : vector<1x128x128xbf16> to vector<128x128xbf16>
    %cst_54 = arith.constant dense<0.000000e+00> : vector<64x128xf32>
    %45 = tpu.matmul %42, %44, %cst_54 {dimension_numbers = #tpu.dot_dimension_numbers<[1], [0], [0], [1], [0, 0, 1, 1], [], []>} : vector<64x128xbf16>, vector<128x128xbf16>, vector<64x128xf32> -> vector<64x128xf32>
    %46 = arith.addf %39, %45 : vector<64x128xf32>
    %c0_55 = arith.constant 0 : index
    %c2_56 = arith.constant 2 : index
    %c0_57 = arith.constant 0 : index
    %c0_58 = arith.constant 0 : index
    %47 = tpu.strided_load %arg7[%c0_55, %c2_56, %c0_57, %c0_58] {strides = array<i32: 1, 2, 2, 1>} : memref<1x18x18x128xf32, #tpu.memory_space<vmem>>, vector<1x8x8x128xf32>
    %48 = vector.shape_cast %47 : vector<1x8x8x128xf32> to vector<64x128xf32>
    %49 = arith.truncf %48 : vector<64x128xf32> to vector<64x128xbf16>
    %c6 = arith.constant 6 : index
    %c0_59 = arith.constant 0 : index
    %c0_60 = arith.constant 0 : index
    %50 = vector.load %arg2[%c6, %c0_59, %c0_60] : memref<9x128x128xbf16, #tpu.memory_space<vmem>>, vector<1x128x128xbf16>
    %51 = vector.shape_cast %50 : vector<1x128x128xbf16> to vector<128x128xbf16>
    %cst_61 = arith.constant dense<0.000000e+00> : vector<64x128xf32>
    %52 = tpu.matmul %49, %51, %cst_61 {dimension_numbers = #tpu.dot_dimension_numbers<[1], [0], [0], [1], [0, 0, 1, 1], [], []>} : vector<64x128xbf16>, vector<128x128xbf16>, vector<64x128xf32> -> vector<64x128xf32>
    %53 = arith.addf %46, %52 : vector<64x128xf32>
    %c0_62 = arith.constant 0 : index
    %c2_63 = arith.constant 2 : index
    %c1_64 = arith.constant 1 : index
    %c0_65 = arith.constant 0 : index
    %54 = tpu.strided_load %arg7[%c0_62, %c2_63, %c1_64, %c0_65] {strides = array<i32: 1, 2, 2, 1>} : memref<1x18x18x128xf32, #tpu.memory_space<vmem>>, vector<1x8x8x128xf32>
    %55 = vector.shape_cast %54 : vector<1x8x8x128xf32> to vector<64x128xf32>
    %56 = arith.truncf %55 : vector<64x128xf32> to vector<64x128xbf16>
    %c7 = arith.constant 7 : index
    %c0_66 = arith.constant 0 : index
    %c0_67 = arith.constant 0 : index
    %57 = vector.load %arg2[%c7, %c0_66, %c0_67] : memref<9x128x128xbf16, #tpu.memory_space<vmem>>, vector<1x128x128xbf16>
    %58 = vector.shape_cast %57 : vector<1x128x128xbf16> to vector<128x128xbf16>
    %cst_68 = arith.constant dense<0.000000e+00> : vector<64x128xf32>
    %59 = tpu.matmul %56, %58, %cst_68 {dimension_numbers = #tpu.dot_dimension_numbers<[1], [0], [0], [1], [0, 0, 1, 1], [], []>} : vector<64x128xbf16>, vector<128x128xbf16>, vector<64x128xf32> -> vector<64x128xf32>
    %60 = arith.addf %53, %59 : vector<64x128xf32>
    %c0_69 = arith.constant 0 : index
    %c2_70 = arith.constant 2 : index
    %c2_71 = arith.constant 2 : index
    %c0_72 = arith.constant 0 : index
    %61 = tpu.strided_load %arg7[%c0_69, %c2_70, %c2_71, %c0_72] {strides = array<i32: 1, 2, 2, 1>} : memref<1x18x18x128xf32, #tpu.memory_space<vmem>>, vector<1x8x8x128xf32>
    %62 = vector.shape_cast %61 : vector<1x8x8x128xf32> to vector<64x128xf32>
    %63 = arith.truncf %62 : vector<64x128xf32> to vector<64x128xbf16>
    %c8 = arith.constant 8 : index
    %c0_73 = arith.constant 0 : index
    %c0_74 = arith.constant 0 : index
    %64 = vector.load %arg2[%c8, %c0_73, %c0_74] : memref<9x128x128xbf16, #tpu.memory_space<vmem>>, vector<1x128x128xbf16>
    %65 = vector.shape_cast %64 : vector<1x128x128xbf16> to vector<128x128xbf16>
    %cst_75 = arith.constant dense<0.000000e+00> : vector<64x128xf32>
    %66 = tpu.matmul %63, %65, %cst_75 {dimension_numbers = #tpu.dot_dimension_numbers<[1], [0], [0], [1], [0, 0, 1, 1], [], []>} : vector<64x128xbf16>, vector<128x128xbf16>, vector<64x128xf32> -> vector<64x128xf32>
    %67 = arith.addf %60, %66 : vector<64x128xf32>
    %c0_76 = arith.constant 0 : index
    %c0_77 = arith.constant 0 : index
    %68 = vector.load %arg5[%c0_76, %c0_77] : memref<8x128xf32, #tpu.memory_space<vmem>>, vector<1x128xf32>
    %69 = vector.broadcast %68 : vector<1x128xf32> to vector<64x128xf32>
    %70 = arith.addf %67, %69 : vector<64x128xf32>
    %71 = arith.negf %70 : vector<64x128xf32>
    %72 = math.exp %71 : vector<64x128xf32>
    %cst_78 = arith.constant 1.000000e+00 : f32
    %73 = vector.broadcast %cst_78 : f32 to vector<64x128xf32>
    %74 = arith.addf %73, %72 : vector<64x128xf32>
    %75 = arith.divf %73, %74 : vector<64x128xf32>
    %76 = arith.mulf %70, %75 : vector<64x128xf32>
    %77 = arith.truncf %76 : vector<64x128xf32> to vector<64x128xbf16>
    %c0_79 = arith.constant 0 : index
    %c0_80 = arith.constant 0 : index
    %c0_81 = arith.constant 0 : index
    %78 = vector.load %arg3[%c0_79, %c0_80, %c0_81] : memref<6x128x128xbf16, #tpu.memory_space<vmem>>, vector<1x128x128xbf16>
    %79 = vector.shape_cast %78 : vector<1x128x128xbf16> to vector<128x128xbf16>
    %cst_82 = arith.constant dense<0.000000e+00> : vector<64x128xf32>
    %80 = tpu.matmul %77, %79, %cst_82 {dimension_numbers = #tpu.dot_dimension_numbers<[1], [0], [0], [1], [0, 0, 1, 1], [], []>} : vector<64x128xbf16>, vector<128x128xbf16>, vector<64x128xf32> -> vector<64x128xf32>
    %c1_83 = arith.constant 1 : index
    %c0_84 = arith.constant 0 : index
    %81 = vector.load %arg5[%c1_83, %c0_84] : memref<8x128xf32, #tpu.memory_space<vmem>>, vector<1x128xf32>
    %82 = vector.broadcast %81 : vector<1x128xf32> to vector<64x128xf32>
    %83 = arith.addf %80, %82 : vector<64x128xf32>
    %84 = arith.negf %83 : vector<64x128xf32>
    %85 = math.exp %84 : vector<64x128xf32>
    %cst_85 = arith.constant 1.000000e+00 : f32
    %86 = vector.broadcast %cst_85 : f32 to vector<64x128xf32>
    %87 = arith.addf %86, %85 : vector<64x128xf32>
    %88 = arith.divf %86, %87 : vector<64x128xf32>
    %89 = arith.mulf %83, %88 : vector<64x128xf32>
    %cst_86 = arith.constant 0.000000e+00 : f32
    %90 = vector.broadcast %cst_86 : f32 to vector<1x10x10x128xf32>
    %c0_87 = arith.constant 0 : index
    %c0_88 = arith.constant 0 : index
    %c0_89 = arith.constant 0 : index
    %c0_90 = arith.constant 0 : index
    %91 = vector.load %arg8[%c0_87, %c0_88, %c0_89, %c0_90] : memref<1x10x10x128xf32, #tpu.memory_space<vmem>>, vector<1x10x10x128xf32>
    tpu.vector_store %arg8[%c0_87, %c0_88, %c0_89, %c0_90], %90 {strides = array<i32>} : memref<1x10x10x128xf32, #tpu.memory_space<vmem>>, vector<1x10x10x128xf32>,
    %92 = vector.shape_cast %89 : vector<64x128xf32> to vector<1x8x8x128xf32>
    %c0_91 = arith.constant 0 : index
    %c1_92 = arith.constant 1 : index
    %c1_93 = arith.constant 1 : index
    %c0_94 = arith.constant 0 : index
    %93 = vector.load %arg8[%c0_91, %c1_92, %c1_93, %c0_94] : memref<1x10x10x128xf32, #tpu.memory_space<vmem>>, vector<1x8x8x128xf32>
    tpu.vector_store %arg8[%c0_91, %c1_92, %c1_93, %c0_94], %92 {strides = array<i32>} : memref<1x10x10x128xf32, #tpu.memory_space<vmem>>, vector<1x8x8x128xf32>,
    %c0_95 = arith.constant 0 : index
    %c0_96 = arith.constant 0 : index
    %94 = vector.load %arg4[%c0_95, %c0_96] : memref<9x128xf32, #tpu.memory_space<vmem>>, vector<9x128xf32>
    %cst_97 = arith.constant 0.000000e+00 : f32
    %95 = vector.broadcast %cst_97 : f32 to vector<1x8x8x128xf32>
    %c0_98 = arith.constant 0 : index
    %c0_99 = arith.constant 0 : index
    %c0_100 = arith.constant 0 : index
    %c0_101 = arith.constant 0 : index
    %96 = vector.load %arg8[%c0_98, %c0_99, %c0_100, %c0_101] : memref<1x10x10x128xf32, #tpu.memory_space<vmem>>, vector<1x8x8x128xf32>
    %97 = vector.extract_strided_slice %94 {offsets = [0, 0], sizes = [1, 128], strides = [1, 1]} : vector<9x128xf32> to vector<1x128xf32>
    %98 = vector.shape_cast %97 : vector<1x128xf32> to vector<1x1x1x128xf32>
    %99 = vector.broadcast %98 : vector<1x1x1x128xf32> to vector<1x8x8x128xf32>
    %100 = arith.mulf %96, %99 : vector<1x8x8x128xf32>
    %101 = arith.addf %95, %100 : vector<1x8x8x128xf32>
    %c0_102 = arith.constant 0 : index
    %c0_103 = arith.constant 0 : index
    %c1_104 = arith.constant 1 : index
    %c0_105 = arith.constant 0 : index
    %102 = vector.load %arg8[%c0_102, %c0_103, %c1_104, %c0_105] : memref<1x10x10x128xf32, #tpu.memory_space<vmem>>, vector<1x8x8x128xf32>
    %103 = vector.extract_strided_slice %94 {offsets = [1, 0], sizes = [1, 128], strides = [1, 1]} : vector<9x128xf32> to vector<1x128xf32>
    %104 = vector.shape_cast %103 : vector<1x128xf32> to vector<1x1x1x128xf32>
    %105 = vector.broadcast %104 : vector<1x1x1x128xf32> to vector<1x8x8x128xf32>
    %106 = arith.mulf %102, %105 : vector<1x8x8x128xf32>
    %107 = arith.addf %101, %106 : vector<1x8x8x128xf32>
    %c0_106 = arith.constant 0 : index
    %c0_107 = arith.constant 0 : index
    %c2_108 = arith.constant 2 : index
    %c0_109 = arith.constant 0 : index
    %108 = vector.load %arg8[%c0_106, %c0_107, %c2_108, %c0_109] : memref<1x10x10x128xf32, #tpu.memory_space<vmem>>, vector<1x8x8x128xf32>
    %109 = vector.extract_strided_slice %94 {offsets = [2, 0], sizes = [1, 128], strides = [1, 1]} : vector<9x128xf32> to vector<1x128xf32>
    %110 = vector.shape_cast %109 : vector<1x128xf32> to vector<1x1x1x128xf32>
    %111 = vector.broadcast %110 : vector<1x1x1x128xf32> to vector<1x8x8x128xf32>
    %112 = arith.mulf %108, %111 : vector<1x8x8x128xf32>
    %113 = arith.addf %107, %112 : vector<1x8x8x128xf32>
    %c0_110 = arith.constant 0 : index
    %c1_111 = arith.constant 1 : index
    %c0_112 = arith.constant 0 : index
    %c0_113 = arith.constant 0 : index
    %114 = vector.load %arg8[%c0_110, %c1_111, %c0_112, %c0_113] : memref<1x10x10x128xf32, #tpu.memory_space<vmem>>, vector<1x8x8x128xf32>
    %115 = vector.extract_strided_slice %94 {offsets = [3, 0], sizes = [1, 128], strides = [1, 1]} : vector<9x128xf32> to vector<1x128xf32>
    %116 = vector.shape_cast %115 : vector<1x128xf32> to vector<1x1x1x128xf32>
    %117 = vector.broadcast %116 : vector<1x1x1x128xf32> to vector<1x8x8x128xf32>
    %118 = arith.mulf %114, %117 : vector<1x8x8x128xf32>
    %119 = arith.addf %113, %118 : vector<1x8x8x128xf32>
    %c0_114 = arith.constant 0 : index
    %c1_115 = arith.constant 1 : index
    %c1_116 = arith.constant 1 : index
    %c0_117 = arith.constant 0 : index
    %120 = vector.load %arg8[%c0_114, %c1_115, %c1_116, %c0_117] : memref<1x10x10x128xf32, #tpu.memory_space<vmem>>, vector<1x8x8x128xf32>
    %121 = vector.extract_strided_slice %94 {offsets = [4, 0], sizes = [1, 128], strides = [1, 1]} : vector<9x128xf32> to vector<1x128xf32>
    %122 = vector.shape_cast %121 : vector<1x128xf32> to vector<1x1x1x128xf32>
    %123 = vector.broadcast %122 : vector<1x1x1x128xf32> to vector<1x8x8x128xf32>
    %124 = arith.mulf %120, %123 : vector<1x8x8x128xf32>
    %125 = arith.addf %119, %124 : vector<1x8x8x128xf32>
    %c0_118 = arith.constant 0 : index
    %c1_119 = arith.constant 1 : index
    %c2_120 = arith.constant 2 : index
    %c0_121 = arith.constant 0 : index
    %126 = vector.load %arg8[%c0_118, %c1_119, %c2_120, %c0_121] : memref<1x10x10x128xf32, #tpu.memory_space<vmem>>, vector<1x8x8x128xf32>
    %127 = vector.extract_strided_slice %94 {offsets = [5, 0], sizes = [1, 128], strides = [1, 1]} : vector<9x128xf32> to vector<1x128xf32>
    %128 = vector.shape_cast %127 : vector<1x128xf32> to vector<1x1x1x128xf32>
    %129 = vector.broadcast %128 : vector<1x1x1x128xf32> to vector<1x8x8x128xf32>
    %130 = arith.mulf %126, %129 : vector<1x8x8x128xf32>
    %131 = arith.addf %125, %130 : vector<1x8x8x128xf32>
    %c0_122 = arith.constant 0 : index
    %c2_123 = arith.constant 2 : index
    %c0_124 = arith.constant 0 : index
    %c0_125 = arith.constant 0 : index
    %132 = vector.load %arg8[%c0_122, %c2_123, %c0_124, %c0_125] : memref<1x10x10x128xf32, #tpu.memory_space<vmem>>, vector<1x8x8x128xf32>
    %133 = vector.extract_strided_slice %94 {offsets = [6, 0], sizes = [1, 128], strides = [1, 1]} : vector<9x128xf32> to vector<1x128xf32>
    %134 = vector.shape_cast %133 : vector<1x128xf32> to vector<1x1x1x128xf32>
    %135 = vector.broadcast %134 : vector<1x1x1x128xf32> to vector<1x8x8x128xf32>
    %136 = arith.mulf %132, %135 : vector<1x8x8x128xf32>
    %137 = arith.addf %131, %136 : vector<1x8x8x128xf32>
    %c0_126 = arith.constant 0 : index
    %c2_127 = arith.constant 2 : index
    %c1_128 = arith.constant 1 : index
    %c0_129 = arith.constant 0 : index
    %138 = vector.load %arg8[%c0_126, %c2_127, %c1_128, %c0_129] : memref<1x10x10x128xf32, #tpu.memory_space<vmem>>, vector<1x8x8x128xf32>
    %139 = vector.extract_strided_slice %94 {offsets = [7, 0], sizes = [1, 128], strides = [1, 1]} : vector<9x128xf32> to vector<1x128xf32>
    %140 = vector.shape_cast %139 : vector<1x128xf32> to vector<1x1x1x128xf32>
    %141 = vector.broadcast %140 : vector<1x1x1x128xf32> to vector<1x8x8x128xf32>
    %142 = arith.mulf %138, %141 : vector<1x8x8x128xf32>
    %143 = arith.addf %137, %142 : vector<1x8x8x128xf32>
    %c0_130 = arith.constant 0 : index
    %c2_131 = arith.constant 2 : index
    %c2_132 = arith.constant 2 : index
    %c0_133 = arith.constant 0 : index
    %144 = vector.load %arg8[%c0_130, %c2_131, %c2_132, %c0_133] : memref<1x10x10x128xf32, #tpu.memory_space<vmem>>, vector<1x8x8x128xf32>
    %145 = vector.extract_strided_slice %94 {offsets = [8, 0], sizes = [1, 128], strides = [1, 1]} : vector<9x128xf32> to vector<1x128xf32>
    %146 = vector.shape_cast %145 : vector<1x128xf32> to vector<1x1x1x128xf32>
    %147 = vector.broadcast %146 : vector<1x1x1x128xf32> to vector<1x8x8x128xf32>
    %148 = arith.mulf %144, %147 : vector<1x8x8x128xf32>
    %149 = arith.addf %143, %148 : vector<1x8x8x128xf32>
    %c2_134 = arith.constant 2 : index
    %c0_135 = arith.constant 0 : index
    %150 = vector.load %arg5[%c2_134, %c0_135] : memref<8x128xf32, #tpu.memory_space<vmem>>, vector<1x128xf32>
    %151 = vector.shape_cast %150 : vector<1x128xf32> to vector<1x1x1x128xf32>
    %152 = vector.broadcast %151 : vector<1x1x1x128xf32> to vector<1x8x8x128xf32>
    %153 = arith.addf %149, %152 : vector<1x8x8x128xf32>
    %154 = arith.negf %153 : vector<1x8x8x128xf32>
    %155 = math.exp %154 : vector<1x8x8x128xf32>
    %cst_136 = arith.constant 1.000000e+00 : f32
    %156 = vector.broadcast %cst_136 : f32 to vector<1x8x8x128xf32>
    %157 = arith.addf %156, %155 : vector<1x8x8x128xf32>
    %158 = arith.divf %156, %157 : vector<1x8x8x128xf32>
    %159 = arith.mulf %153, %158 : vector<1x8x8x128xf32>
    %160 = vector.shape_cast %159 : vector<1x8x8x128xf32> to vector<64x128xf32>
    %cst_137 = arith.constant dense<0.000000e+00> : vector<128xf32>
    %161 = vector.multi_reduction <add>, %160, %cst_137 [0] : vector<64x128xf32> to vector<128xf32>
    %162 = vector.shape_cast %161 : vector<128xf32> to vector<1x128xf32>
    %cst_138 = arith.constant 1.562500e-02 : f32
    %163 = vector.broadcast %cst_138 : f32 to vector<1x128xf32>
    %164 = arith.mulf %162, %163 : vector<1x128xf32>
    %165 = arith.truncf %164 : vector<1x128xf32> to vector<1x128xbf16>
    %c1_139 = arith.constant 1 : index
    %c0_140 = arith.constant 0 : index
    %c0_141 = arith.constant 0 : index
    %166 = vector.load %arg3[%c1_139, %c0_140, %c0_141] : memref<6x128x128xbf16, #tpu.memory_space<vmem>>, vector<1x128x128xbf16>
    %167 = vector.shape_cast %166 : vector<1x128x128xbf16> to vector<128x128xbf16>
    %cst_142 = arith.constant dense<0.000000e+00> : vector<1x128xf32>
    %168 = tpu.matmul %165, %167, %cst_142 {dimension_numbers = #tpu.dot_dimension_numbers<[1], [0], [0], [1], [0, 0, 1, 1], [], []>} : vector<1x128xbf16>, vector<128x128xbf16>, vector<1x128xf32> -> vector<1x128xf32>
    %c3_143 = arith.constant 3 : index
    %c0_144 = arith.constant 0 : index
    %169 = vector.load %arg5[%c3_143, %c0_144] : memref<8x128xf32, #tpu.memory_space<vmem>>, vector<1x128xf32>
    %170 = arith.addf %168, %169 : vector<1x128xf32>
    %171 = arith.negf %170 : vector<1x128xf32>
    %172 = math.exp %171 : vector<1x128xf32>
    %cst_145 = arith.constant 1.000000e+00 : f32
    %173 = vector.broadcast %cst_145 : f32 to vector<1x128xf32>
    %174 = arith.addf %173, %172 : vector<1x128xf32>
    %175 = arith.divf %173, %174 : vector<1x128xf32>
    %176 = arith.mulf %170, %175 : vector<1x128xf32>
    %177 = arith.truncf %176 : vector<1x128xf32> to vector<1x128xbf16>
    %c2_146 = arith.constant 2 : index
    %c0_147 = arith.constant 0 : index
    %c0_148 = arith.constant 0 : index
    %178 = vector.load %arg3[%c2_146, %c0_147, %c0_148] : memref<6x128x128xbf16, #tpu.memory_space<vmem>>, vector<1x128x128xbf16>
    %179 = vector.shape_cast %178 : vector<1x128x128xbf16> to vector<128x128xbf16>
    %cst_149 = arith.constant dense<0.000000e+00> : vector<1x128xf32>
    %180 = tpu.matmul %177, %179, %cst_149 {dimension_numbers = #tpu.dot_dimension_numbers<[1], [0], [0], [1], [0, 0, 1, 1], [], []>} : vector<1x128xbf16>, vector<128x128xbf16>, vector<1x128xf32> -> vector<1x128xf32>
    %c4_150 = arith.constant 4 : index
    %c0_151 = arith.constant 0 : index
    %181 = vector.load %arg5[%c4_150, %c0_151] : memref<8x128xf32, #tpu.memory_space<vmem>>, vector<1x128xf32>
    %182 = arith.addf %180, %181 : vector<1x128xf32>
    %183 = arith.negf %182 : vector<1x128xf32>
    %184 = math.exp %183 : vector<1x128xf32>
    %cst_152 = arith.constant 1.000000e+00 : f32
    %185 = vector.broadcast %cst_152 : f32 to vector<1x128xf32>
    %186 = arith.addf %185, %184 : vector<1x128xf32>
    %187 = arith.divf %185, %186 : vector<1x128xf32>
    %188 = vector.broadcast %187 : vector<1x128xf32> to vector<64x128xf32>
    %189 = arith.mulf %160, %188 : vector<64x128xf32>
    %190 = arith.truncf %189 : vector<64x128xf32> to vector<64x128xbf16>
    %c3_153 = arith.constant 3 : index
    %c0_154 = arith.constant 0 : index
    %c0_155 = arith.constant 0 : index
    %191 = vector.load %arg3[%c3_153, %c0_154, %c0_155] : memref<6x128x128xbf16, #tpu.memory_space<vmem>>, vector<1x128x128xbf16>
    %192 = vector.shape_cast %191 : vector<1x128x128xbf16> to vector<128x128xbf16>
    %cst_156 = arith.constant dense<0.000000e+00> : vector<64x128xf32>
    %193 = tpu.matmul %190, %192, %cst_156 {dimension_numbers = #tpu.dot_dimension_numbers<[1], [0], [0], [1], [0, 0, 1, 1], [], []>} : vector<64x128xbf16>, vector<128x128xbf16>, vector<64x128xf32> -> vector<64x128xf32>
    %c5_157 = arith.constant 5 : index
    %c0_158 = arith.constant 0 : index
    %194 = vector.load %arg5[%c5_157, %c0_158] : memref<8x128xf32, #tpu.memory_space<vmem>>, vector<1x128xf32>
    %195 = vector.broadcast %194 : vector<1x128xf32> to vector<64x128xf32>
    %196 = arith.addf %193, %195 : vector<64x128xf32>
    %197 = arith.addf %196, %76 : vector<64x128xf32>
    %198 = arith.truncf %197 : vector<64x128xf32> to vector<64x128xbf16>
    %c4_159 = arith.constant 4 : index
    %c0_160 = arith.constant 0 : index
    %c0_161 = arith.constant 0 : index
    %199 = vector.load %arg3[%c4_159, %c0_160, %c0_161] : memref<6x128x128xbf16, #tpu.memory_space<vmem>>, vector<1x128x128xbf16>
    %200 = vector.shape_cast %199 : vector<1x128x128xbf16> to vector<128x128xbf16>
    %cst_162 = arith.constant dense<0.000000e+00> : vector<64x128xf32>
    %201 = tpu.matmul %198, %200, %cst_162 {dimension_numbers = #tpu.dot_dimension_numbers<[1], [0], [0], [1], [0, 0, 1, 1], [], []>} : vector<64x128xbf16>, vector<128x128xbf16>, vector<64x128xf32> -> vector<64x128xf32>
    %c6_163 = arith.constant 6 : index
    %c0_164 = arith.constant 0 : index
    %202 = vector.load %arg5[%c6_163, %c0_164] : memref<8x128xf32, #tpu.memory_space<vmem>>, vector<1x128xf32>
    %203 = vector.broadcast %202 : vector<1x128xf32> to vector<64x128xf32>
    %204 = arith.addf %201, %203 : vector<64x128xf32>
    %205 = arith.negf %204 : vector<64x128xf32>
    %206 = math.exp %205 : vector<64x128xf32>
    %cst_165 = arith.constant 1.000000e+00 : f32
    %207 = vector.broadcast %cst_165 : f32 to vector<64x128xf32>
    %208 = arith.addf %207, %206 : vector<64x128xf32>
    %209 = arith.divf %207, %208 : vector<64x128xf32>
    %210 = arith.mulf %204, %209 : vector<64x128xf32>
    %cst_166 = arith.constant dense<0.000000e+00> : vector<128xf32>
    %211 = vector.multi_reduction <add>, %210, %cst_166 [0] : vector<64x128xf32> to vector<128xf32>
    %212 = vector.shape_cast %211 : vector<128xf32> to vector<1x128xf32>
    %cst_167 = arith.constant 1.562500e-02 : f32
    %213 = vector.broadcast %cst_167 : f32 to vector<1x128xf32>
    %214 = arith.mulf %212, %213 : vector<1x128xf32>
    %215 = arith.truncf %214 : vector<1x128xf32> to vector<1x128xbf16>
    %c5_168 = arith.constant 5 : index
    %c0_169 = arith.constant 0 : index
    %c0_170 = arith.constant 0 : index
    %216 = vector.load %arg3[%c5_168, %c0_169, %c0_170] : memref<6x128x128xbf16, #tpu.memory_space<vmem>>, vector<1x128x128xbf16>
    %217 = vector.shape_cast %216 : vector<1x128x128xbf16> to vector<128x128xbf16>
    %cst_171 = arith.constant dense<0.000000e+00> : vector<1x128xf32>
    %218 = tpu.matmul %215, %217, %cst_171 {dimension_numbers = #tpu.dot_dimension_numbers<[1], [0], [0], [1], [0, 0, 1, 1], [], []>} : vector<1x128xbf16>, vector<128x128xbf16>, vector<1x128xf32> -> vector<1x128xf32>
    %c7_172 = arith.constant 7 : index
    %c0_173 = arith.constant 0 : index
    %219 = vector.load %arg5[%c7_172, %c0_173] : memref<8x128xf32, #tpu.memory_space<vmem>>, vector<1x128xf32>
    %220 = arith.addf %218, %219 : vector<1x128xf32>
    %221 = vector.shape_cast %220 : vector<1x128xf32> to vector<1x1x128xf32>
    %222 = vector.shape_cast %221 : vector<1x1x128xf32> to vector<1x1x128xf32>
    %223 = vector.broadcast %222 : vector<1x1x128xf32> to vector<1x8x128xf32>
    %c0_174 = arith.constant 0 : index
    %c0_175 = arith.constant 0 : index
    %c0_176 = arith.constant 0 : index
    %224 = vector.load %arg6[%c0_174, %c0_175, %c0_176] : memref<1x8x128xf32, #tpu.memory_space<vmem>>, vector<1x8x128xf32>
    tpu.vector_store %arg6[%c0_174, %c0_175, %c0_176], %223 {strides = array<i32>} : memref<1x8x128xf32, #tpu.memory_space<vmem>>, vector<1x8x128xf32>,
    return
  }
  func.func @transform_0(%arg0: i32) -> (i32, i32, i32, i32) {
    %c0_i32 = arith.constant 0 : i32
    %c0_i32_0 = arith.constant 0 : i32
    %c0_i32_1 = arith.constant 0 : i32
    %c0_i32_2 = arith.constant 0 : i32
    return %arg0, %c0_i32, %c0_i32_0, %c0_i32_1 : i32, i32, i32, i32
  }
  func.func @transform_1(%arg0: i32) -> (i32, i32, i32) {
    %c0_i32 = arith.constant 0 : i32
    %c0_i32_0 = arith.constant 0 : i32
    %c0_i32_1 = arith.constant 0 : i32
    %c0_i32_2 = arith.constant 0 : i32
    return %c0_i32, %c0_i32_0, %c0_i32_1 : i32, i32, i32
  }
  func.func @transform_2(%arg0: i32) -> (i32, i32, i32) {
    %c0_i32 = arith.constant 0 : i32
    %c0_i32_0 = arith.constant 0 : i32
    %c0_i32_1 = arith.constant 0 : i32
    %c0_i32_2 = arith.constant 0 : i32
    return %c0_i32, %c0_i32_0, %c0_i32_1 : i32, i32, i32
  }
  func.func @transform_3(%arg0: i32) -> (i32, i32) {
    %c0_i32 = arith.constant 0 : i32
    %c0_i32_0 = arith.constant 0 : i32
    %c0_i32_1 = arith.constant 0 : i32
    return %c0_i32, %c0_i32_0 : i32, i32
  }
  func.func @transform_4(%arg0: i32) -> (i32, i32) {
    %c0_i32 = arith.constant 0 : i32
    %c0_i32_0 = arith.constant 0 : i32
    %c0_i32_1 = arith.constant 0 : i32
    return %c0_i32, %c0_i32_0 : i32, i32
  }
  func.func @transform_5(%arg0: i32) -> (i32, i32, i32) {
    %c0_i32 = arith.constant 0 : i32
    %c0_i32_0 = arith.constant 0 : i32
    %c0_i32_1 = arith.constant 0 : i32
    return %arg0, %c0_i32, %c0_i32_0 : i32, i32, i32
  }
}

</mosaic_0001>

<bundles_post_ra>
// kernel: forward.1
= control target key start
LH: loop header
LB: loop body
LE: loop exit
PB: predicated region body
PF: predicated region fallthrough
CT: control target
= control target key end

     0   :  { %s4388_s18 = smov 0   ;;  %s5292_s0 = inlined_call_operand.vmem [shape: f32[2,16,16,128], index: 0, kind: input, shape index: {}]   ;;  %s5293_s1 = inlined_call_operand.vmem [shape: bf16[9,128,128], index: 1, kind: input, shape index: {}]   ;;  %s5294_s2 = inlined_call_operand.vmem [shape: bf16[6,128,128], index: 2, kind: input, shape index: {}]   ;;  %s5295_s3 = inlined_call_operand.vmem [shape: f32[9,128], index: 3, kind: input, shape index: {}]   ;;  %s5296_s4 = inlined_call_operand.vmem [shape: f32[8,128], index: 4, kind: input, shape index: {}]   ;;  %s5297_s5 = inlined_call_operand.vmem [shape: f32[2,8,128], index: 5, kind: output, shape index: {}]  }
   0x1 LB: > { %s3182_s19 = sadd.s32 4294967295, %s4354_s18   ;;  %p3186_p0 = scmp.ge.s32.totalorder %s4354_s18, 1  ;;  %s4354_s18 = sphi %s4388_s18, %s15_s18  }
   0x2   : > { %p187_p1 = scmp.lt.s32.totalorder %s4354_s18, 3 }
   0x4   : > { %p188_p2 = pnand %p3186_p0, %p187_p1 }
   0x6   : > { %191 = sbr.rel (%p188_p2) target bundleno = 1895 (0x767), region = 40 }
   0xb   : > { %v4399_v0 = vld [vmem:[%s5293_s1 + $0x78] sm:$0xff]   ;;  %v4410_v2 = vld [vmem:[%s5293_s1 + $0x70] sm:$0xff]   ;;  %p4414_p3 = scmp.lt.s32.totalorder %s3182_s19, 1  ;;  %v4356_v3 = vmov 0.0   ;;  %v4094_v5 = vld [vmem:[%s5293_s1 + $0x68] sm:$0xff]   ;;  %vm4357_vm0 = vmmov 0  }
   0xc   : > { %v4404_v1 = vld [vmem:[%s5293_s1 + $0x38] sm:$0xff]   ;;  %3732 = vmatprep.subr.bf16.mxu0 %v4399_v0  ;;  %224 = vst [vmem:[#allocation2] sm:$0xff] %v4356_v3  ;;  %225 = vst [vmem:[#allocation2 + $0x8] sm:$0xff] %v4356_v3  ;;  %v4093_v4 = vld [vmem:[%s5293_s1 + $0x30] sm:$0xff]  }
   0xd   : > { %230 = vst [vmem:[#allocation2 + $0x30] sm:$0xff] %v4356_v3  ;;  %231 = vst [vmem:[#allocation2 + $0x38] sm:$0xff] %v4356_v3  ;;  %3756 = vmatprep.subr.bf16.mxu1 %v4404_v1  ;;  %3733 = vmatpush3.bf16.msra.mxu0 %v4399_v0  ;;  %v4095_v6 = vld [vmem:[%s5293_s1 + $0x28] sm:$0xff]   ;;  %s5334_s19 = smov (!%p4414_p3, %s3182_s19), 1  ;;  %v4096_v7 = vld [vmem:[%s5293_s1 + $0x60] sm:$0xff]  }
   0xe   : > { %232 = vst [vmem:[#allocation2 + $0x40] sm:$0x3] %v4356_v3  ;;  %226 = vst [vmem:[#allocation2 + $0x10] sm:$0x3] %v4356_v3  ;;  %3757 = vmatpush3.bf16.msra.mxu1 %v4404_v1  ;;  %3734 = vmatprep.subr.bf16.mxu0 %v4410_v2  ;;  %v4097_v8 = vld [vmem:[%s5293_s1 + $0x20] sm:$0xff]   ;;  %s3560_s12 = sshll.u32 %s5334_s19, 8 }
   0xf   : > { %227 = vst [vmem:[#allocation2 + $0x18] sm:$0xff] %v4356_v3  ;;  %228 = vst [vmem:[#allocation2 + $0x20] sm:$0xff] %v4356_v3  ;;  %3758 = vmatprep.subr.bf16.mxu1 %v4093_v4  ;;  %v4098_v9 = vld [vmem:[%s5293_s1 + $0x58] sm:$0xff]   ;;  %s4525_s21 = scalar_lea.vmem %s5292_s0, %s3560_s12  ;;  %v4100_v11 = vld [vmem:[%s5293_s1 + $0x50] sm:$0xff]   ;;  %s3189_s10 = sshll.u32 %s5334_s19, 3 }
  0x10   : > { %229 = vst [vmem:[#allocation2 + $0x28] sm:$0x3] %v4356_v3  ;;  %233 = vst [vmem:[#allocation2 + $0x48] sm:$0xff] %v4356_v3  ;;  %v4099_v10 = vld [vmem:[%s5293_s1 + $0x18] sm:$0xff]   ;;  %v280_v12 = vld [vmem:[%s4525_s21 + $0x10] sm:$0xff]  ;;  %s222_s13 = scalar_lea.vmem %s5297_s5, %s3189_s10 }
  0x11   : > { %234 = vst [vmem:[#allocation2 + $0x50] sm:$0xff] %v4356_v3  ;;  %235 = vst [vmem:[#allocation2 + $0x58] sm:$0x3] %v4356_v3  ;;  %3735 = vmatpush3.bf16.msra.mxu0 %v4410_v2  ;;  %v281_v13 = vld [vmem:[%s4525_s21 + $0x18] sm:$0xff]  ;;  %v4101_v14 = vld [vmem:[%s5293_s1 + $0x10] sm:$0xff]  }
  0x12   : > { %236 = vst [vmem:[#allocation2 + $0x60] sm:$0xff] %v4356_v3  ;;  %237 = vst [vmem:[#allocation2 + $0x68] sm:$0xff] %v4356_v3  ;;  %3759 = vmatpush3.bf16.msra.mxu1 %v4093_v4  ;;  %3736 = vmatprep.subr.bf16.mxu0 %v4094_v5  ;;  %v284_v15 = vld [vmem:[%s4525_s21 + $0x30] sm:$0xff]  ;;  %v285_v16 = vld [vmem:[%s4525_s21 + $0x38] sm:$0xff] }
  0x13   : > { %238 = vst [vmem:[#allocation2 + $0x70] sm:$0x3] %v4356_v3  ;;  %239 = vst [vmem:[#allocation2 + $0x78] sm:$0xff] %v4356_v3  ;;  %3760 = vmatprep.subr.bf16.mxu1 %v4095_v6  ;;  %v288_v17 = vld [vmem:[%s4525_s21 + $0x50] sm:$0xff]  ;;  %v289_v18 = vld [vmem:[%s4525_s21 + $0x58] sm:$0xff] }
  0x14   : > { %240 = vst [vmem:[#allocation2 + $0x80] sm:$0xff] %v4356_v3  ;;  %241 = vst [vmem:[#allocation2 + $0x88] sm:$0x3] %v4356_v3  ;;  %v4102_v19 = vld [vmem:[%s5293_s1 + $0x48] sm:$0xff]   ;;  %v4104_v23 = vld [vmem:[%s5293_s1 + $0x40] sm:$0xff]  }
  0x15   : > { %242 = vst [vmem:[#allocation2 + $0x90] sm:$0xff] %v4356_v3  ;;  %243 = vst [vmem:[#allocation2 + $0x98] sm:$0xff] %v4356_v3  ;;  %3737 = vmatpush3.bf16.msra.mxu0 %v4094_v5  ;;  %v4103_v20 = vld [vmem:[%s5293_s1 + $0x8] sm:$0xff]   ;;  %v4105_v26 = vld [vmem:[%s5293_s1] sm:$0xff]  }
  0x16   : > { %244 = vst [vmem:[#allocation2 + $0xa0] sm:$0x3] %v4356_v3  ;;  %245 = vst [vmem:[#allocation2 + $0xa8] sm:$0xff] %v4356_v3  ;;  %3761 = vmatpush3.bf16.msra.mxu1 %v4095_v6  ;;  %3738 = vmatprep.subr.bf16.mxu0 %v4096_v7  ;;  %v379_v21 = vld [vmem:[#allocation2 + $0x1] ss:$2 sm:$0xff]  ;;  %v4106_v31 = vld [vmem:[%s5293_s1 + $0xb8] sm:$0xff]  }
  0x17   : > { %246 = vst [vmem:[#allocation2 + $0xb0] sm:$0xff] %v4356_v3  ;;  %247 = vst [vmem:[#allocation2 + $0xb8] sm:$0x3] %v4356_v3  ;;  %3762 = vmatprep.subr.bf16.mxu1 %v4097_v8  ;;  %v343_v22 = vld [vmem:[#allocation2] ss:$2 sm:$0xff]  ;;  %v4107_v34 = vld [vmem:[%s5293_s1 + $0xf8] sm:$0xff]  }
  0x18   : > { %248 = vst [vmem:[#allocation2 + $0xc0] sm:$0xff] %v4356_v3  ;;  %249 = vst [vmem:[#allocation2 + $0xc8] sm:$0xff] %v4356_v3  ;;  %v292_v35 = vld [vmem:[%s4525_s21 + $0x70] sm:$0xff]  ;;  %v293_v38 = vld [vmem:[%s4525_s21 + $0x78] sm:$0xff] }
  0x19   : > { %250 = vst [vmem:[#allocation2 + $0xd0] sm:$0x3] %v4356_v3  ;;  %251 = vst [vmem:[#allocation2 + $0xd8] sm:$0xff] %v4356_v3  ;;  %3739 = vmatpush3.bf16.msra.mxu0 %v4096_v7  ;;  %v4108_v37 = vld [vmem:[%s5293_s1 + $0xb0] sm:$0xff]   ;;  %v297_v40 = vld [vmem:[%s4525_s21 + $0x98] sm:$0xff] }
  0x1a   : > { %252 = vst [vmem:[#allocation2 + $0xe0] sm:$0xff] %v4356_v3  ;;  %253 = vst [vmem:[#allocation2 + $0xe8] sm:$0x3] %v4356_v3  ;;  %3763 = vmatpush3.bf16.msra.mxu1 %v4097_v8  ;;  %3740 = vmatprep.subr.bf16.mxu0 %v4098_v9  ;;  %v296_v39 = vld [vmem:[%s4525_s21 + $0x90] sm:$0xff]  ;;  %v301_v44 = vld [vmem:[%s4525_s21 + $0xb8] sm:$0xff] }
  0x1b   : > { %254 = vst [vmem:[#allocation2 + $0xf0] sm:$0xff] %v4356_v3  ;;  %255 = vst [vmem:[#allocation2 + $0xf8] sm:$0xff] %v4356_v3  ;;  %3764 = vmatprep.subr.bf16.mxu1 %v4099_v10  ;;  %v4109_v42 = vld [vmem:[%s5293_s1 + $0xf0] sm:$0xff]   ;;  %v305_v46 = vld [vmem:[%s4525_s21 + $0xd8] sm:$0xff] }
  0x1c   : > { %256 = vst [vmem:[#allocation2 + $0x100] sm:$0x3] %v4356_v3  ;;  %257 = vst [vmem:[#allocation2 + $0x108] sm:$0xff] %v4356_v3  ;;  %v300_v43 = vld [vmem:[%s4525_s21 + $0xb0] sm:$0xff]  ;;  %v4110_v47 = vld [vmem:[%s5293_s1 + $0xa8] sm:$0xff]  }
  0x1d   : > { %258 = vst [vmem:[#allocation2 + $0x110] sm:$0xff] %v4356_v3  ;;  %259 = vst [vmem:[#allocation2 + $0x118] sm:$0x3] %v4356_v3  ;;  %3741 = vmatpush3.bf16.msra.mxu0 %v4098_v9  ;;  %v304_v45 = vld [vmem:[%s4525_s21 + $0xd0] sm:$0xff]  ;;  %v4111_v48 = vld [vmem:[%s5293_s1 + $0xe8] sm:$0xff]  }
  0x1e   : > { %260 = vst [vmem:[#allocation2 + $0x120] sm:$0xff] %v4356_v3  ;;  %261 = vst [vmem:[#allocation2 + $0x128] sm:$0xff] %v4356_v3  ;;  %3765 = vmatpush3.bf16.msra.mxu1 %v4099_v10  ;;  %3742 = vmatprep.subr.bf16.mxu0 %v4100_v11  ;;  %v4112_v52 = vld [vmem:[%s5293_s1 + $0xa0] sm:$0xff]   ;;  %v4114_v1 = vld [vmem:[%s5293_s1 + $0x98] sm:$0xff]  }
  0x1f   : > { %262 = vst [vmem:[#allocation2 + $0x130] sm:$0x3] %v4356_v3  ;;  %263 = vst [vmem:[#allocation2 + $0x138] sm:$0xff] %v4356_v3  ;;  %3766 = vmatprep.subr.bf16.mxu1 %v4101_v14  ;;  %v4113_v58 = vld [vmem:[%s5293_s1 + $0xe0] sm:$0xff]   ;;  %v279_v5 = vld [vmem:[%s4525_s21 + $0x8] sm:$0xff] }
  0x20   : > { %264 = vst [vmem:[#allocation2 + $0x140] sm:$0xff] %v4356_v3  ;;  %265 = vst [vmem:[#allocation2 + $0x148] sm:$0x3] %v4356_v3  ;;  %v642_v63 = vld [vmem:[#allocation2 + $0x2] ss:$2 sm:$0xff] }
  0x21   : > { %266 = vst [vmem:[#allocation2 + $0x150] sm:$0xff] %v4356_v3  ;;  %267 = vst [vmem:[#allocation2 + $0x158] sm:$0xff] %v4356_v3  ;;  %3743 = vmatpush3.bf16.msra.mxu0 %v4100_v11  ;;  %v278_v4 = vld [vmem:[%s4525_s21] sm:$0xff]  ;;  %v283_v7 = vld [vmem:[%s4525_s21 + $0x28] sm:$0xff] }
  0x22   : > { %268 = vst [vmem:[#allocation2 + $0x160] sm:$0x3] %v4356_v3  ;;  %269 = vst [vmem:[#allocation2 + $0x168] sm:$0xff] %v4356_v3  ;;  %3767 = vmatpush3.bf16.msra.mxu1 %v4101_v14  ;;  %3744 = vmatprep.subr.bf16.mxu0 %v4102_v19  ;;  %v282_v6 = vld [vmem:[%s4525_s21 + $0x20] sm:$0xff]  ;;  %v287_v9 = vld [vmem:[%s4525_s21 + $0x48] sm:$0xff] }
  0x23   : > { %270 = vst [vmem:[#allocation2 + $0x170] sm:$0xff] %v4356_v3  ;;  %271 = vst [vmem:[#allocation2 + $0x178] sm:$0x3] %v4356_v3  ;;  %3768 = vmatprep.subr.bf16.mxu1 %v4103_v20  ;;  %v286_v8 = vld [vmem:[%s4525_s21 + $0x40] sm:$0xff]  ;;  %v291_v11 = vld [vmem:[%s4525_s21 + $0x68] sm:$0xff] }
  0x24   : > { %272 = vst [vmem:[#allocation2 + $0x180] sm:$0xff] %v4356_v3  ;;  %273 = vst [vmem:[#allocation2 + $0x188] sm:$0xff] %v4356_v3  ;;  %v290_v10 = vld [vmem:[%s4525_s21 + $0x60] sm:$0xff]  ;;  %v4118_v14 = vld [vmem:[%s5293_s1 + $0x88] sm:$0xff]  }
  0x25   : > { %274 = vst [vmem:[#allocation2 + $0x190] sm:$0x3] %v4356_v3  ;;  %2009 = vst [vmem:[#allocation3] sm:$0xff] %v4356_v3  ;;  %3745 = vmatpush3.bf16.msra.mxu0 %v4102_v19  ;;  %v295_v19 = vld [vmem:[%s4525_s21 + $0x88] sm:$0xff] }
  0x26   : > { %2010 = vst [vmem:[#allocation3 + $0x8] sm:$0x3] %v4356_v3  ;;  %2011 = vst [vmem:[#allocation3 + $0x10] sm:$0xff] %v4356_v3  ;;  %3769 = vmatpush3.bf16.msra.mxu1 %v4103_v20  ;;  %3746 = vmatprep.subr.bf16.mxu0 %v4104_v23  ;;  %v298_v20 = vld [vmem:[%s4525_s21 + $0xa0] sm:$0xff] }
  0x27   : > { %2012 = vst [vmem:[#allocation3 + $0x18] sm:$0x3] %v4356_v3  ;;  %2013 = vst [vmem:[#allocation3 + $0x20] sm:$0xff] %v4356_v3  ;;  %3770 = vmatprep.subr.bf16.mxu1 %v4105_v26 }
  0x28   : > { %2014 = vst [vmem:[#allocation3 + $0x28] sm:$0x3] %v4356_v3  ;;  %2015 = vst [vmem:[#allocation3 + $0x30] sm:$0xff] %v4356_v3 }
  0x29   : > { %2016 = vst [vmem:[#allocation3 + $0x38] sm:$0x3] %v4356_v3  ;;  %2017 = vst [vmem:[#allocation3 + $0x40] sm:$0xff] %v4356_v3  ;;  %3747 = vmatpush3.bf16.msra.mxu0 %v4104_v23  ;;  %v299_v23 = vld [vmem:[%s4525_s21 + $0xa8] sm:$0xff] }
  0x2a   : > { %2018 = vst [vmem:[#allocation3 + $0x48] sm:$0x3] %v4356_v3  ;;  %2019 = vst [vmem:[#allocation3 + $0x50] sm:$0xff] %v4356_v3  ;;  %3771 = vmatpush3.bf16.msra.mxu1 %v4105_v26  ;;  %3780 = vmatprep.subr.bf16.mxu0 %v4106_v31  ;;  %v303_v26 = vld [vmem:[%s4525_s21 + $0xc8] sm:$0xff] }
  0x2b   : > { %2020 = vst [vmem:[#allocation3 + $0x58] sm:$0x3] %v4356_v3  ;;  %2021 = vst [vmem:[#allocation3 + $0x60] sm:$0xff] %v4356_v3  ;;  %3804 = vmatprep.subr.bf16.mxu1 %v4107_v34 }
  0x2c   : > { %2022 = vst [vmem:[#allocation3 + $0x68] sm:$0x3] %v4356_v3  ;;  %2023 = vst [vmem:[#allocation3 + $0x70] sm:$0xff] %v4356_v3 }
  0x2d   : > { %2024 = vst [vmem:[#allocation3 + $0x78] sm:$0x3] %v4356_v3  ;;  %2025 = vst [vmem:[#allocation3 + $0x80] sm:$0xff] %v4356_v3 }
  0x2e   : > { %2026 = vst [vmem:[#allocation3 + $0x88] sm:$0x3] %v4356_v3  ;;  %2027 = vst [vmem:[#allocation3 + $0x90] sm:$0xff] %v4356_v3 }
  0x2f   : > { %2028 = vst [vmem:[#allocation3 + $0x98] sm:$0x3] %v4356_v3  ;;  %313 = vst [vmem:[#allocation2 + $0x31] sm:$0xff] %v280_v12  ;;  %v4115_v3 = vld [vmem:[%s5293_s1 + $0xd8] sm:$0xff]   ;;  %v4116_v12 = vld [vmem:[%s5293_s1 + $0x90] sm:$0xff]  }
  0x30   : > { %314 = vst [vmem:[#allocation2 + $0x39] sm:$0xff] %v281_v13  ;;  %317 = vst [vmem:[#allocation2 + $0x61] sm:$0xff] %v284_v15  ;;  %v4117_v13 = vld [vmem:[%s5293_s1 + $0xd0] sm:$0xff]   ;;  %v4119_v15 = vld [vmem:[%s5293_s1 + $0xc8] sm:$0xff]  }
  0x31   : > { %318 = vst [vmem:[#allocation2 + $0x69] sm:$0xff] %v285_v16  ;;  %321 = vst [vmem:[#allocation2 + $0x91] sm:$0xff] %v288_v17  ;;  %v294_v17 = vld [vmem:[%s4525_s21 + $0x80] sm:$0xff] }
  0x32   : > { %322 = vst [vmem:[#allocation2 + $0x99] sm:$0xff] %v289_v18  ;;  %325 = vst [vmem:[#allocation2 + $0xc1] sm:$0xff] %v292_v35 }
  0x33   : > { %326 = vst [vmem:[#allocation2 + $0xc9] sm:$0xff] %v293_v38  ;;  %329 = vst [vmem:[#allocation2 + $0xf1] sm:$0xff] %v296_v39 }
  0x34   : > { %330 = vst [vmem:[#allocation2 + $0xf9] sm:$0xff] %v297_v40  ;;  %333 = vst [vmem:[#allocation2 + $0x121] sm:$0xff] %v300_v43 }
  0x35   : > { %334 = vst [vmem:[#allocation2 + $0x129] sm:$0xff] %v301_v44  ;;  %337 = vst [vmem:[#allocation2 + $0x151] sm:$0xff] %v304_v45 }
  0x36   : > { %338 = vst [vmem:[#allocation2 + $0x159] sm:$0xff] %v305_v46  ;;  %311 = vst [vmem:[#allocation2 + $0x19] sm:$0xff] %v278_v4  ;;  %v4137_v4 = vld [vmem:[%s5293_s1 + $0x140] sm:$0xff]  }
  0x37   : > { %v381_v24 = vld [vmem:[#allocation2 + $0x31] ss:$2 sm:$0xff]  ;;  %v345_v25 = vld [vmem:[#allocation2 + $0x30] ss:$2 sm:$0xff]  ;;  %312 = vst [vmem:[#allocation2 + $0x21] sm:$0xff] %v279_v5  ;;  %315 = vst [vmem:[#allocation2 + $0x49] sm:$0xff] %v282_v6 }
  0x38   : > { %v394_v27 = vpack.c.bf16 %v381_v24, %v379_v21  ;;  %v358_v28 = vpack.c.bf16 %v345_v25, %v343_v22  ;;  %v383_v29 = vld [vmem:[#allocation2 + $0x61] ss:$2 sm:$0xff]  ;;  %v347_v30 = vld [vmem:[#allocation2 + $0x60] ss:$2 sm:$0xff]  ;;  %316 = vst [vmem:[#allocation2 + $0x51] sm:$0xff] %v283_v7  ;;  %319 = vst [vmem:[#allocation2 + $0x79] sm:$0xff] %v286_v8 }
  0x39   : > { %v385_v32 = vld [vmem:[#allocation2 + $0x91] ss:$2 sm:$0xff]  ;;  %v349_v33 = vld [vmem:[#allocation2 + $0x90] ss:$2 sm:$0xff]  ;;  %320 = vst [vmem:[#allocation2 + $0x81] sm:$0xff] %v287_v9  ;;  %323 = vst [vmem:[#allocation2 + $0xa9] sm:$0xff] %v290_v10 }
  0x3a   : > { %3748 = vmatprep.mubr.bf16.mxu0 %v394_v27  ;;  %3772 = vmatprep.mubr.bf16.mxu1 %v358_v28  ;;  %v395_v36 = vpack.c.bf16 %v385_v32, %v383_v29  ;;  %v359_v41 = vpack.c.bf16 %v349_v33, %v347_v30  ;;  %v387_v49 = vld [vmem:[#allocation2 + $0xc1] ss:$2 sm:$0xff]  ;;  %v351_v51 = vld [vmem:[#allocation2 + $0xc0] ss:$2 sm:$0xff]  ;;  %324 = vst [vmem:[#allocation2 + $0xb1] sm:$0xff] %v291_v11  ;;  %327 = vst [vmem:[#allocation2 + $0xd9] sm:$0xff] %v294_v17 }
  0x3b   : > { %v389_v50 = vld [vmem:[#allocation2 + $0xf1] ss:$2 sm:$0xff]  ;;  %v353_v54 = vld [vmem:[#allocation2 + $0xf0] ss:$2 sm:$0xff]  ;;  %v4120_v21 = vld [vmem:[%s5293_s1 + $0x80] sm:$0xff]   ;;  %328 = vst [vmem:[#allocation2 + $0xe1] sm:$0xff] %v295_v19 }
  0x3c   : > { %3749 = vmatmul.mubr.bf16.vlgmr.msra.gmra.mxu0 %v395_v36  ;;  %3773 = vmatmul.mubr.bf16.vlgmr.msra.gmra.mxu1 %v359_v41  ;;  %v396_v53 = vpack.c.bf16 %v389_v50, %v387_v49  ;;  %v360_v55 = vpack.c.bf16 %v353_v54, %v351_v51  ;;  %v391_v56 = vld [vmem:[#allocation2 + $0x121] ss:$2 sm:$0xff]  ;;  %v355_v57 = vld [vmem:[#allocation2 + $0x120] ss:$2 sm:$0xff]  ;;  %331 = vst [vmem:[#allocation2 + $0x109] sm:$0xff] %v298_v20  ;;  %332 = vst [vmem:[#allocation2 + $0x111] sm:$0xff] %v299_v23 }
  0x3d   : > { %3781 = vmatpush3.bf16.msra.mxu0 %v4106_v31  ;;  %3805 = vmatpush3.bf16.msra.mxu1 %v4107_v34  ;;  %v393_v59 = vld [vmem:[#allocation2 + $0x151] ss:$2 sm:$0xff]  ;;  %v357_v60 = vld [vmem:[#allocation2 + $0x150] ss:$2 sm:$0xff]  ;;  %v4121_v24 = vld [vmem:[%s5293_s1 + $0xc0] sm:$0xff]   ;;  %336 = vst [vmem:[#allocation2 + $0x141] sm:$0xff] %v303_v26 }
  0x3e   : > { %3782 = vmatprep.subr.bf16.mxu0 %v4108_v37  ;;  %3806 = vmatprep.subr.bf16.mxu1 %v4109_v42  ;;  %v397_v61 = vpack.c.bf16 %v393_v59, %v391_v56  ;;  %v361_v62 = vpack.c.bf16 %v357_v60, %v355_v57  ;;  %v644_v0 = vld [vmem:[#allocation2 + $0x32] ss:$2 sm:$0xff]  ;;  %v307_v28 = vld [vmem:[%s4525_s21 + $0xe8] sm:$0xff]  ;;  %v957_v51 = vld [vmem:[#allocation2 + $0x19] ss:$2 sm:$0xff] }
  0x3f   : > { %3752 = vmatprep.mubr.bf16.mxu0 %v396_v53  ;;  %3776 = vmatprep.mubr.bf16.mxu1 %v360_v55  ;;  %v657_v2 = vpack.c.bf16 %v644_v0, %v642_v63  ;;  %v799_v16 = vld [vmem:[#allocation2 + $0x18] ss:$2 sm:$0xff]  ;;  %v801_v18 = vld [vmem:[#allocation2 + $0x48] ss:$2 sm:$0xff]  ;;  %340 = vst [vmem:[#allocation2 + $0x171] sm:$0xff] %v307_v28 }
  0x40   : > { %v814_v22 = vpack.c.bf16 %v801_v18, %v799_v16  ;;  %v302_v25 = vld [vmem:[%s4525_s21 + $0xc0] sm:$0xff]  ;;  %v4122_v31 = vld [vmem:[%s5293_s1 + $0x138] sm:$0xff]   ;;  %v4124_v41 = vld [vmem:[%s5293_s1 + $0x130] sm:$0xff]  }
  0x41   : > { %3783 = vmatpush3.bf16.msra.mxu0 %v4108_v37  ;;  %3807 = vmatpush3.bf16.msra.mxu1 %v4109_v42  ;;  %v306_v27 = vld [vmem:[%s4525_s21 + $0xe0] sm:$0xff]  ;;  %335 = vst [vmem:[#allocation2 + $0x139] sm:$0xff] %v302_v25  ;;  %v805_v33 = vld [vmem:[#allocation2 + $0xa8] ss:$2 sm:$0xff]  ;;  %v4123_v34 = vld [vmem:[%s5293_s1 + $0x178] sm:$0xff]  }
  0x42   : > { %3784 = vmatprep.subr.bf16.mxu0 %v4110_v47  ;;  %3808 = vmatprep.subr.bf16.mxu1 %v4111_v48  ;;  %339 = vst [vmem:[#allocation2 + $0x169] sm:$0xff] %v306_v27  ;;  %v646_v29 = vld [vmem:[#allocation2 + $0x62] ss:$2 sm:$0xff]  ;;  %v648_v30 = vld [vmem:[#allocation2 + $0x92] ss:$2 sm:$0xff] }
  0x43   : > { %v803_v32 = vld [vmem:[#allocation2 + $0x78] ss:$2 sm:$0xff]  ;;  %v658_v36 = vpack.c.bf16 %v648_v30, %v646_v29  ;;  %v809_v40 = vld [vmem:[#allocation2 + $0x108] ss:$2 sm:$0xff]  ;;  %v959_v53 = vld [vmem:[#allocation2 + $0x49] ss:$2 sm:$0xff] }
  0x44   : > { %3753 = vmatmul.mubr.bf16.gmra.mxu0 %v397_v61  ;;  %3777 = vmatmul.mubr.bf16.gmra.mxu1 %v361_v62  ;;  %v650_v35 = vld [vmem:[#allocation2 + $0xc2] ss:$2 sm:$0xff]  ;;  %v652_v37 = vld [vmem:[#allocation2 + $0xf2] ss:$2 sm:$0xff]  ;;  %v815_v39 = vpack.c.bf16 %v805_v33, %v803_v32  ;;  %v972_v59 = vpack.c.bf16 %v959_v53, %v957_v51  ;;  %v961_v5 = vld [vmem:[#allocation2 + $0x79] ss:$2 sm:$0xff] }
  0x45   : > { %3785 = vmatpush3.bf16.msra.mxu0 %v4110_v47  ;;  %3809 = vmatpush3.bf16.msra.mxu1 %v4111_v48  ;;  %v807_v38 = vld [vmem:[#allocation2 + $0xd8] ss:$2 sm:$0xff]  ;;  %v4125_v42 = vld [vmem:[%s5293_s1 + $0x170] sm:$0xff]   ;;  %v659_v43 = vpack.c.bf16 %v652_v37, %v650_v35  ;;  %v4126_v47 = vld [vmem:[%s5293_s1 + $0x128] sm:$0xff]  }
  0x46   : > { %3786 = vmatprep.subr.bf16.mxu0 %v4112_v52  ;;  %3810 = vmatprep.subr.bf16.mxu1 %v4113_v58  ;;  %v654_v44 = vld [vmem:[#allocation2 + $0x122] ss:$2 sm:$0xff]  ;;  %v656_v45 = vld [vmem:[#allocation2 + $0x152] ss:$2 sm:$0xff]  ;;  %v816_v46 = vpack.c.bf16 %v809_v40, %v807_v38  ;;  %v963_v6 = vld [vmem:[#allocation2 + $0xa9] ss:$2 sm:$0xff] }
  0x47   : > { %3796 = vmatprep.mubr.bf16.mxu0 %v657_v2  ;;  %3820 = vmatprep.mubr.bf16.mxu1 %v814_v22  ;;  %v4127_v50 = vld [vmem:[%s5293_s1 + $0x168] sm:$0xff]   ;;  %v4128_v57 = vld [vmem:[%s5293_s1 + $0x120] sm:$0xff]   ;;  %v4130_v61 = vld [vmem:[%s5293_s1 + $0x118] sm:$0xff]  }
  0x48   : > { %v811_v48 = vld [vmem:[#allocation2 + $0x138] ss:$2 sm:$0xff]  ;;  %v4132_v63 = vld [vmem:[%s5293_s1 + $0x110] sm:$0xff]   ;;  %v4135_v2 = vld [vmem:[%s5293_s1 + $0x148] sm:$0xff]  }
  0x49   : > { %3787 = vmatpush3.bf16.msra.mxu0 %v4112_v52  ;;  %3811 = vmatpush3.bf16.msra.mxu1 %v4113_v58  ;;  %v813_v49 = vld [vmem:[#allocation2 + $0x168] ss:$2 sm:$0xff]  ;;  %v660_v52 = vpack.c.bf16 %v656_v45, %v654_v44  ;;  %v4129_v58 = vld [vmem:[%s5293_s1 + $0x160] sm:$0xff]   ;;  %v4131_v62 = vld [vmem:[%s5293_s1 + $0x158] sm:$0xff]  }
  0x4a   : > { %3788 = vmatprep.subr.bf16.mxu0 %v4114_v1  ;;  %3812 = vmatprep.subr.bf16.mxu1 %v4115_v3  ;;  %v817_v54 = vpack.c.bf16 %v813_v49, %v811_v48  ;;  %v1115_v55 = vld [vmem:[#allocation2 + $0x1a] ss:$2 sm:$0xff]  ;;  %v1117_v56 = vld [vmem:[#allocation2 + $0x4a] ss:$2 sm:$0xff]  ;;  %v965_v11 = vld [vmem:[#allocation2 + $0xd9] ss:$2 sm:$0xff] }
  0x4b   : > { %v1130_v60 = vpack.c.bf16 %v1117_v56, %v1115_v55  ;;  %v4133_v0 = vld [vmem:[%s5293_s1 + $0x150] sm:$0xff]   ;;  %v4138_v7 = vld [vmem:[%s5293_s1 + $0x1b8] sm:$0xff]   ;;  %v4143_v28 = vld [vmem:[%s5293_s1 + $0x1e8] sm:$0xff]  }
  0x4c   : > { %v1119_v8 = vld [vmem:[#allocation2 + $0x7a] ss:$2 sm:$0xff]  ;;  %v1121_v9 = vld [vmem:[#allocation2 + $0xaa] ss:$2 sm:$0xff]  ;;  %v969_v22 = vld [vmem:[#allocation2 + $0x139] ss:$2 sm:$0xff] }
  0x4d   : > { %3789 = vmatpush3.bf16.msra.mxu0 %v4114_v1  ;;  %3813 = vmatpush3.bf16.msra.mxu1 %v4115_v3  ;;  %v4134_v1 = vld [vmem:[%s5293_s1 + $0x108] sm:$0xff]   ;;  %v4136_v3 = vld [vmem:[%s5293_s1 + $0x100] sm:$0xff]   ;;  %v4139_v10 = vld [vmem:[%s5293_s1 + $0x1f8] sm:$0xff]  }
  0x4e   : > { %3790 = vmatprep.subr.bf16.mxu0 %v4116_v12  ;;  %3814 = vmatprep.subr.bf16.mxu1 %v4117_v13  ;;  %v1125_v16 = vld [vmem:[#allocation2 + $0x10a] ss:$2 sm:$0xff]  ;;  %v971_v23 = vld [vmem:[#allocation2 + $0x169] ss:$2 sm:$0xff]  ;;  %v1127_v26 = vld [vmem:[#allocation2 + $0x13a] ss:$2 sm:$0xff] }
  0x4f   : > { %v308_v17 = vld [vmem:[%s4525_s21 + $0xf0] sm:$0xff]  ;;  %v309_v18 = vld [vmem:[%s4525_s21 + $0xf8] sm:$0xff]  ;;  %v975_v30 = vpack.c.bf16 %v971_v23, %v969_v22  ;;  %v4144_v35 = vld [vmem:[%s5293_s1 + $0x1a0] sm:$0xff]  }
  0x50   : > { %v4140_v19 = vld [vmem:[%s5293_s1 + $0x1b0] sm:$0xff]   ;;  %341 = vst [vmem:[#allocation2 + $0x181] sm:$0xff] %v308_v17  ;;  %342 = vst [vmem:[#allocation2 + $0x189] sm:$0xff] %v309_v18  ;;  %v4146_v38 = vld [vmem:[%s5293_s1 + $0x198] sm:$0xff]  }
  0x51   : > { %3791 = vmatpush3.bf16.msra.mxu0 %v4116_v12  ;;  %3815 = vmatpush3.bf16.msra.mxu1 %v4117_v13  ;;  %v973_v12 = vpack.c.bf16 %v963_v6, %v961_v5  ;;  %v967_v13 = vld [vmem:[#allocation2 + $0x109] ss:$2 sm:$0xff]  ;;  %v1129_v27 = vld [vmem:[#allocation2 + $0x16a] ss:$2 sm:$0xff]  ;;  %v4152_v45 = vld [vmem:[%s5293_s1 + $0x180] sm:$0xff]  }
  0x52   : > { %3792 = vmatprep.subr.bf16.mxu0 %v4118_v14  ;;  %3816 = vmatprep.subr.bf16.mxu1 %v4119_v15  ;;  %v4141_v20 = vld [vmem:[%s5293_s1 + $0x1f0] sm:$0xff]   ;;  %v1133_v32 = vpack.c.bf16 %v1129_v27, %v1127_v26  ;;  %v4147_v40 = vld [vmem:[%s5293_s1 + $0x1d8] sm:$0xff]   ;;  %v4151_v44 = vld [vmem:[%s5293_s1 + $0x1c8] sm:$0xff]  }
  0x53   : > { %v1273_v29 = vld [vmem:[#allocation2 + $0x30] ss:$2 sm:$0xff]  ;;  %v1431_v33 = vld [vmem:[#allocation2 + $0x31] ss:$2 sm:$0xff]  ;;  %v1279_v48 = vld [vmem:[#allocation2 + $0xc0] ss:$2 sm:$0xff] }
  0x54   : > { %v4154_v49 = vld [vmem:[%s5293_s1 + $0x238] sm:$0xff]   ;;  %v1437_v51 = vld [vmem:[#allocation2 + $0xc1] ss:$2 sm:$0xff]  ;;  %v1283_v53 = vld [vmem:[#allocation2 + $0x120] ss:$2 sm:$0xff] }
  0x55   : > { %3793 = vmatpush3.bf16.msra.mxu0 %v4118_v14  ;;  %3817 = vmatpush3.bf16.msra.mxu1 %v4119_v15  ;;  %v1123_v14 = vld [vmem:[#allocation2 + $0xda] ss:$2 sm:$0xff]  ;;  %v1131_v15 = vpack.c.bf16 %v1121_v9, %v1119_v8  ;;  %v1441_v55 = vld [vmem:[#allocation2 + $0x121] ss:$2 sm:$0xff]  ;;  %v4159_v9 = vld [vmem:[%s5293_s1 + $0x210] sm:$0xff]  }
  0x56   : > { %3794 = vmatprep.subr.bf16.mxu0 %v4120_v21  ;;  %3818 = vmatprep.subr.bf16.mxu1 %v4121_v24  ;;  %v1132_v25 = vpack.c.bf16 %v1125_v16, %v1123_v14  ;;  %v4157_v5 = vld [vmem:[%s5293_s1 + $0x220] sm:$0xff]   ;;  %v4158_v8 = vld [vmem:[%s5293_s1 + $0x218] sm:$0xff]   ;;  %v4163_v26 = vld [vmem:[%s5294_s2 + $0x30] sm:$0xff]  }
  0x57   : > { %v1597_v14 = vld [vmem:[#allocation2 + $0xf2] ss:$2 sm:$0xff] }
  0x58   : > { %v4745_v18 = vld [vmem:[#allocation2] sm:$0xff] }
  0x59   : > { %3795 = vmatpush3.bf16.msra.mxu0 %v4120_v21  ;;  %3819 = vmatpush3.bf16.msra.mxu1 %v4121_v24  ;;  %v974_v21 = vpack.c.bf16 %v967_v13, %v965_v11  ;;  %v4142_v24 = vld [vmem:[%s5293_s1 + $0x1a8] sm:$0xff]   ;;  %v4161_v11 = vld [vmem:[%s5293_s1 + $0x200] sm:$0xff]   ;;  %5309 = vst [vmem:[#allocation4_spill] sm:$0xff] %v4745_v18 }
  0x5a   : > { %3828 = vmatprep.subr.bf16.mxu0 %v4122_v31  ;;  %3852 = vmatprep.subr.bf16.mxu1 %v4123_v34  ;;  %v1595_v13 = vld [vmem:[#allocation2 + $0xc2] ss:$2 sm:$0xff] }
  0x5c   : > { %3797 = vmatmul.mubr.bf16.vlgmr.msra.gmra.mxu0 %v658_v36  ;;  %3821 = vmatmul.mubr.bf16.vlgmr.msra.gmra.mxu1 %v815_v39  ;;  %v4145_v36 = vld [vmem:[%s5293_s1 + $0x1e0] sm:$0xff]  }
  0x5d   : > { %3829 = vmatpush3.bf16.msra.mxu0 %v4122_v31  ;;  %3853 = vmatpush3.bf16.msra.mxu1 %v4123_v34  ;;  %v1275_v31 = vld [vmem:[#allocation2 + $0x60] ss:$2 sm:$0xff]  ;;  %v1433_v34 = vld [vmem:[#allocation2 + $0x61] ss:$2 sm:$0xff] }
  0x5e   : > { %3830 = vmatprep.subr.bf16.mxu0 %v4124_v41  ;;  %3854 = vmatprep.subr.bf16.mxu1 %v4125_v42  ;;  %v1288_v37 = vpack.c.bf16 %v1275_v31, %v1273_v29  ;;  %v1446_v39 = vpack.c.bf16 %v1433_v34, %v1431_v33  ;;  %v4164_v29 = vld [vmem:[%s5294_s2 + $0x28] sm:$0xff]  }
  0x5f   : > { %3800 = vmatprep.mubr.bf16.mxu0 %v659_v43  ;;  %3824 = vmatprep.mubr.bf16.mxu1 %v816_v46  ;;  %v4150_v43 = vld [vmem:[%s5293_s1 + $0x188] sm:$0xff]   ;;  %v4153_v46 = vld [vmem:[%s5293_s1 + $0x1c0] sm:$0xff]  }
  0x61   : > { %3831 = vmatpush3.bf16.msra.mxu0 %v4124_v41  ;;  %3855 = vmatpush3.bf16.msra.mxu1 %v4125_v42  ;;  %v4148_v41 = vld [vmem:[%s5293_s1 + $0x190] sm:$0xff]  }
  0x62   : > { %3832 = vmatprep.subr.bf16.mxu0 %v4126_v47  ;;  %3856 = vmatprep.subr.bf16.mxu1 %v4127_v50  ;;  %v4149_v42 = vld [vmem:[%s5293_s1 + $0x1d0] sm:$0xff]  }
  0x64   : > { %3801 = vmatmul.mubr.bf16.gmra.mxu0 %v660_v52  ;;  %3825 = vmatmul.mubr.bf16.gmra.mxu1 %v817_v54  ;;  %v1281_v52 = vld [vmem:[#allocation2 + $0xf0] ss:$2 sm:$0xff]  ;;  %v1439_v54 = vld [vmem:[#allocation2 + $0xf1] ss:$2 sm:$0xff] }
  0x65   : > { %3833 = vmatpush3.bf16.msra.mxu0 %v4126_v47  ;;  %3857 = vmatpush3.bf16.msra.mxu1 %v4127_v50  ;;  %v1277_v47 = vld [vmem:[#allocation2 + $0x90] ss:$2 sm:$0xff]  ;;  %v1435_v50 = vld [vmem:[#allocation2 + $0x91] ss:$2 sm:$0xff] }
  0x66   : > { %3834 = vmatprep.subr.bf16.mxu0 %v4128_v57  ;;  %3858 = vmatprep.subr.bf16.mxu1 %v4129_v58  ;;  %v1289_v56 = vpack.c.bf16 %v1279_v48, %v1277_v47 }
  0x67   : > { %3844 = vmatprep.mubr.bf16.mxu0 %v972_v59  ;;  %3868 = vmatprep.mubr.bf16.mxu1 %v1130_v60  ;;  %v1290_v59 = vpack.c.bf16 %v1283_v53, %v1281_v52  ;;  %v1285_v60 = vld [vmem:[#allocation2 + $0x150] ss:$2 sm:$0xff] }
  0x69   : > { %3835 = vmatpush3.bf16.msra.mxu0 %v4128_v57  ;;  %3859 = vmatpush3.bf16.msra.mxu1 %v4129_v58  ;;  %v4155_v57 = vld [vmem:[%s5293_s1 + $0x230] sm:$0xff]   ;;  %v1447_v58 = vpack.c.bf16 %v1437_v51, %v1435_v50 }
  0x6a   : > { %3836 = vmatprep.subr.bf16.mxu0 %v4130_v61  ;;  %3860 = vmatprep.subr.bf16.mxu1 %v4131_v62 }
  0x6d   : > { %3837 = vmatpush3.bf16.msra.mxu0 %v4130_v61  ;;  %3861 = vmatpush3.bf16.msra.mxu1 %v4131_v62  ;;  %v1287_v61 = vld [vmem:[#allocation2 + $0x180] ss:$2 sm:$0xff]  ;;  %v1448_v62 = vpack.c.bf16 %v1441_v55, %v1439_v54 }
  0x6e   : > { %3838 = vmatprep.subr.bf16.mxu0 %v4132_v63  ;;  %3862 = vmatprep.subr.bf16.mxu1 %v4133_v0 }
  0x71   : > { %3839 = vmatpush3.bf16.msra.mxu0 %v4132_v63  ;;  %3863 = vmatpush3.bf16.msra.mxu1 %v4133_v0  ;;  %v4156_v63 = vld [vmem:[%s5293_s1 + $0x228] sm:$0xff]   ;;  %v1443_v0 = vld [vmem:[#allocation2 + $0x151] ss:$2 sm:$0xff] }
  0x72   : > { %3840 = vmatprep.subr.bf16.mxu0 %v4134_v1  ;;  %3864 = vmatprep.subr.bf16.mxu1 %v4135_v2 }
  0x75   : > { %3841 = vmatpush3.bf16.msra.mxu0 %v4134_v1  ;;  %3865 = vmatpush3.bf16.msra.mxu1 %v4135_v2  ;;  %v1445_v1 = vld [vmem:[#allocation2 + $0x181] ss:$2 sm:$0xff]  ;;  %v1589_v2 = vld [vmem:[#allocation2 + $0x32] ss:$2 sm:$0xff] }
  0x76   : > { %3842 = vmatprep.subr.bf16.mxu0 %v4136_v3  ;;  %3866 = vmatprep.subr.bf16.mxu1 %v4137_v4  ;;  %v1449_v6 = vpack.c.bf16 %v1445_v1, %v1443_v0 }
  0x79   : > { %3843 = vmatpush3.bf16.msra.mxu0 %v4136_v3  ;;  %3867 = vmatpush3.bf16.msra.mxu1 %v4137_v4  ;;  %v1591_v3 = vld [vmem:[#allocation2 + $0x62] ss:$2 sm:$0xff]  ;;  %v1291_v4 = vpack.c.bf16 %v1287_v61, %v1285_v60 }
  0x7a   : > { %3876 = vmatprep.subr.bf16.mxu0 %v4138_v7  ;;  %3900 = vmatprep.subr.bf16.mxu1 %v4139_v10 }
  0x7c   : > { %3845 = vmatmul.mubr.bf16.vlgmr.msra.gmra.mxu0 %v973_v12  ;;  %3869 = vmatmul.mubr.bf16.vlgmr.msra.gmra.mxu1 %v1131_v15  ;;  %v1593_v12 = vld [vmem:[#allocation2 + $0x92] ss:$2 sm:$0xff]  ;;  %v1599_v15 = vld [vmem:[#allocation2 + $0x122] ss:$2 sm:$0xff] }
  0x7d   : > { %3877 = vmatpush3.bf16.msra.mxu0 %v4138_v7  ;;  %3901 = vmatpush3.bf16.msra.mxu1 %v4139_v10  ;;  %v1604_v7 = vpack.c.bf16 %v1591_v3, %v1589_v2  ;;  %v4160_v10 = vld [vmem:[%s5293_s1 + $0x208] sm:$0xff]   ;;  %v1605_v16 = vpack.c.bf16 %v1595_v13, %v1593_v12  ;;  %v1606_v17 = vpack.c.bf16 %v1599_v15, %v1597_v14 }
  0x7e   : > { %3878 = vmatprep.subr.bf16.mxu0 %v4140_v19  ;;  %3902 = vmatprep.subr.bf16.mxu1 %v4141_v20 }
  0x7f   : > { %3848 = vmatprep.mubr.bf16.mxu0 %v974_v21  ;;  %3872 = vmatprep.mubr.bf16.mxu1 %v1132_v25 }
  0x81   : > { %3879 = vmatpush3.bf16.msra.mxu0 %v4140_v19  ;;  %3903 = vmatpush3.bf16.msra.mxu1 %v4141_v20  ;;  %v1601_v19 = vld [vmem:[#allocation2 + $0x152] ss:$2 sm:$0xff]  ;;  %v1603_v20 = vld [vmem:[#allocation2 + $0x182] ss:$2 sm:$0xff] }
  0x82   : > { %3880 = vmatprep.subr.bf16.mxu0 %v4142_v24  ;;  %3904 = vmatprep.subr.bf16.mxu1 %v4143_v28  ;;  %v1607_v21 = vpack.c.bf16 %v1603_v20, %v1601_v19 }
  0x84   : > { %3849 = vmatmul.mubr.bf16.gmra.mxu0 %v975_v30  ;;  %3873 = vmatmul.mubr.bf16.gmra.mxu1 %v1133_v32  ;;  %v4165_v32 = vld [vmem:[%s5294_s2 + $0x20] sm:$0xff]  }
  0x85   : > { %3881 = vmatpush3.bf16.msra.mxu0 %v4142_v24  ;;  %3905 = vmatpush3.bf16.msra.mxu1 %v4143_v28  ;;  %v4162_v24 = vld [vmem:[%s5294_s2 + $0x38] sm:$0xff]  }
  0x86   : > { %3882 = vmatprep.subr.bf16.mxu0 %v4144_v35  ;;  %3906 = vmatprep.subr.bf16.mxu1 %v4145_v36 }
  0x87   : > { %3892 = vmatprep.mubr.bf16.mxu0 %v1288_v37  ;;  %3916 = vmatprep.mubr.bf16.mxu1 %v1446_v39  ;;  %v4167_v39 = vld [vmem:[%s5294_s2 + $0x10] sm:$0xff]  }
  0x89   : > { %3883 = vmatpush3.bf16.msra.mxu0 %v4144_v35  ;;  %3907 = vmatpush3.bf16.msra.mxu1 %v4145_v36  ;;  %v4166_v35 = vld [vmem:[%s5294_s2 + $0x18] sm:$0xff]  }
  0x8a   : > { %3884 = vmatprep.subr.bf16.mxu0 %v4146_v38  ;;  %3908 = vmatprep.subr.bf16.mxu1 %v4147_v40 }
  0x8d   : > { %3885 = vmatpush3.bf16.msra.mxu0 %v4146_v38  ;;  %3909 = vmatpush3.bf16.msra.mxu1 %v4147_v40 }
  0x8e   : > { %3886 = vmatprep.subr.bf16.mxu0 %v4148_v41  ;;  %3910 = vmatprep.subr.bf16.mxu1 %v4149_v42 }
  0x91   : > { %3887 = vmatpush3.bf16.msra.mxu0 %v4148_v41  ;;  %3911 = vmatpush3.bf16.msra.mxu1 %v4149_v42 }
  0x92   : > { %3888 = vmatprep.subr.bf16.mxu0 %v4150_v43  ;;  %3912 = vmatprep.subr.bf16.mxu1 %v4151_v44 }
  0x95   : > { %3889 = vmatpush3.bf16.msra.mxu0 %v4150_v43  ;;  %3913 = vmatpush3.bf16.msra.mxu1 %v4151_v44  ;;  %v4168_v43 = vld [vmem:[%s5294_s2 + $0x8] sm:$0xff]  }
  0x96   : > { %3890 = vmatprep.subr.bf16.mxu0 %v4152_v45  ;;  %3914 = vmatprep.subr.bf16.mxu1 %v4153_v46 }
  0x99   : > { %3891 = vmatpush3.bf16.msra.mxu0 %v4152_v45  ;;  %3915 = vmatpush3.bf16.msra.mxu1 %v4153_v46  ;;  %v4169_v46 = vld [vmem:[%s5294_s2] sm:$0xff]  }
  0x9a   : > { %3924 = vmatprep.subr.bf16.mxu0 %v4154_v49  ;;  %3948 = vmatprep.subr.bf16.mxu1 %v4162_v24 }
  0x9c   : > { %3893 = vmatmul.mubr.bf16.vlgmr.msra.gmra.mxu0 %v1289_v56  ;;  %3917 = vmatmul.mubr.bf16.vlgmr.msra.gmra.mxu1 %v1447_v58 }
  0x9d   : > { %3925 = vmatpush3.bf16.msra.mxu0 %v4154_v49  ;;  %3896 = vmatprep.mubr.bf16.mxu0 %v1290_v59 }
  0x9e   : > { %3926 = vmatprep.subr.bf16.mxu0 %v4155_v57  ;;  %3920 = vmatprep.mubr.bf16.mxu1 %v1448_v62 }
  0x9f   : > { %3949 = vmatpush3.bf16.msra.mxu1 %v4162_v24 }
  0xa0   : > { %3950 = vmatprep.subr.bf16.mxu1 %v4163_v26 }
  0xa1   : > { %3927 = vmatpush3.bf16.msra.mxu0 %v4155_v57 }
  0xa2   : > { %3928 = vmatprep.subr.bf16.mxu0 %v4156_v63 }
  0xa3   : > { %3951 = vmatpush3.bf16.msra.mxu1 %v4163_v26 }
  0xa4   : > { %3897 = vmatmul.mubr.bf16.gmra.mxu0 %v1291_v4  ;;  %3921 = vmatmul.mubr.bf16.gmra.mxu1 %v1449_v6 }
  0xa5   : > { %3929 = vmatpush3.bf16.msra.mxu0 %v4156_v63  ;;  %3940 = vmatprep.mubr.bf16.mxu0 %v1604_v7 }
  0xa6   : > { %3930 = vmatprep.subr.bf16.mxu0 %v4157_v5  ;;  %3952 = vmatprep.subr.bf16.mxu1 %v4164_v29 }
  0xa7   : > { %3953 = vmatpush3.bf16.msra.mxu1 %v4164_v29 }
  0xa8   : > { %3954 = vmatprep.subr.bf16.mxu1 %v4165_v32 }
  0xa9   : > { %3931 = vmatpush3.bf16.msra.mxu0 %v4157_v5 }
  0xaa   : > { %3932 = vmatprep.subr.bf16.mxu0 %v4158_v8 }
  0xab   : > { %3955 = vmatpush3.bf16.msra.mxu1 %v4165_v32 }
  0xac   : > { %3956 = vmatprep.subr.bf16.mxu1 %v4166_v35 }
  0xad   : > { %3933 = vmatpush3.bf16.msra.mxu0 %v4158_v8 }
  0xae   : > { %3934 = vmatprep.subr.bf16.mxu0 %v4159_v9 }
  0xaf   : > { %3957 = vmatpush3.bf16.msra.mxu1 %v4166_v35 }
  0xb0   : > { %3958 = vmatprep.subr.bf16.mxu1 %v4167_v39 }
  0xb1   : > { %3935 = vmatpush3.bf16.msra.mxu0 %v4159_v9 }
  0xb2   : > { %3936 = vmatprep.subr.bf16.mxu0 %v4160_v10 }
  0xb3   : > { %3959 = vmatpush3.bf16.msra.mxu1 %v4167_v39 }
  0xb4   : > { %3960 = vmatprep.subr.bf16.mxu1 %v4168_v43 }
  0xb5   : > { %3937 = vmatpush3.bf16.msra.mxu0 %v4160_v10 }
  0xb6   : > { %3938 = vmatprep.subr.bf16.mxu0 %v4161_v11 }
  0xb7   : > { %3961 = vmatpush3.bf16.msra.mxu1 %v4168_v43 }
  0xb8   : > { %3962 = vmatprep.subr.bf16.mxu1 %v4169_v46 }
  0xb9   : > { %3939 = vmatpush3.bf16.msra.mxu0 %v4161_v11 }
  0xba   : > { %3972 = vmatprep.subr.bf16.mxu0 %v4745_v18 }
  0xbb   : > { %3963 = vmatpush3.bf16.msra.mxu1 %v4169_v46 }
  0xbc   : > { %3941 = vmatmul.mubr.bf16.vlgmr.msra.gmra.mxu0 %v1605_v16  ;;  %3992 = vmatprep.subr.bf16.mxu1 %v4745_v18 }
  0xbd   : > { %3944 = vmatprep.mubr.bf16.mxu0 %v1606_v17 }
  0xc4   : > { %3945 = vmatmul.mubr.bf16.gmra.mxu0 %v1607_v21 }
  0xfc   : > { %v4748_v22 = vpop.f32.mrf.mxu0  ;;  %v4760_v27 = vpop.f32.mrf.mxu1 }
  0xfd   : > { %v619_v17 = vadd.f32 %v4760_v27, %v4748_v22 }
  0xfe   : > { %v4750_v23 = vpop.f32.mrf.mxu0  ;;  %v4769_v31 = vpop.f32.mrf.mxu1 }
  0xff   : > { %v611_v21 = vadd.f32 %v4769_v31, %v4750_v23 }
 0x100   : > { %v4755_v25 = vpop.f32.mrf.mxu0  ;;  %v4776_v34 = vpop.f32.mrf.mxu1 }
 0x101   : > { %v622_v26 = vadd.f32 %v4776_v34, %v4755_v25 }
 0x102   : > { %v4762_v28 = vpop.f32.mrf.mxu0  ;;  %v613_v37 = vpop.f32.mrf.mxu1 }
 0x103   : > { %v614_v39 = vadd.f32 %v613_v37, %v4762_v28 }
 0x104   : > { %v4767_v30 = vpop.f32.mrf.mxu0  ;;  %v3778_v38 = vpop.f32.mrf.mxu1 }
 0x105   : > { %v635_v18 = vadd.f32 %v3778_v38, %v4767_v30 }
 0x106   : > { %v4774_v33 = vpop.f32.mrf.mxu0  ;;  %v626_v42 = vpop.f32.mrf.mxu1 }
 0x108   : > { %v4781_v36 = vpop.f32.mrf.mxu0  ;;  %v3779_v45 = vpop.f32.mrf.mxu1 }
 0x109   : > { %v638_v25 = vadd.f32 %v3779_v45, %v4781_v36 }
 0x10a   : > { %v4786_v40 = vpop.f32.mrf.mxu0  ;;  %v629_v48 = vpop.f32.mrf.mxu1 }
 0x11c   : > { %v3798_v41 = vpop.f32.mrf.mxu0  ;;  %v3822_v49 = vpop.f32.mrf.mxu1 }
 0x11d   : > { %v793_v24 = vadd.f32 %v3798_v41, %v619_v17 }
 0x11e   : > { %v760_v44 = vpop.f32.mrf.mxu0  ;;  %v917_v51 = vpop.f32.mrf.mxu1 }
 0x11f   : > { %v791_v29 = vadd.f32 %v760_v44, %v611_v21  ;;  %v950_v43 = vadd.f32 %v3822_v49, %v793_v24 }
 0x120   : > { %v3799_v47 = vpop.f32.mrf.mxu0  ;;  %v3823_v53 = vpop.f32.mrf.mxu1 }
 0x121   : > { %v794_v46 = vadd.f32 %v3799_v47, %v622_v26  ;;  %v630_v47 = vadd.f32 %v629_v48, %v4786_v40 }
 0x122   : > { %v763_v50 = vpop.f32.mrf.mxu0  ;;  %v920_v55 = vpop.f32.mrf.mxu1 }
 0x123   : > { %v792_v22 = vadd.f32 %v763_v50, %v614_v39  ;;  %v951_v31 = vadd.f32 %v3823_v53, %v794_v46 }
 0x124   : > { %v3802_v52 = vpop.f32.mrf.mxu0  ;;  %v3826_v57 = vpop.f32.mrf.mxu1 }
 0x125   : > { %v797_v41 = vadd.f32 %v3802_v52, %v635_v18  ;;  %v949_v44 = vadd.f32 %v920_v55, %v792_v22 }
 0x126   : > { %v776_v54 = vpop.f32.mrf.mxu0  ;;  %v933_v60 = vpop.f32.mrf.mxu1 }
 0x127   : > { %v954_v49 = vadd.f32 %v3826_v57, %v797_v41  ;;  %v3390_v57 = vld [vmem:[%s5296_s4] ss:$0 sm:$0xff] }
 0x128   : > { %v3803_v56 = vpop.f32.mrf.mxu0  ;;  %v3827_v62 = vpop.f32.mrf.mxu1 }
 0x129   : > { %v798_v30 = vadd.f32 %v3803_v56, %v638_v25 }
 0x12a   : > { %v779_v58 = vpop.f32.mrf.mxu0  ;;  %v4795_v0 = vpop.f32.mrf.mxu1 }
 0x12b   : > { %v955_v36 = vadd.f32 %v3827_v62, %v798_v30 }
 0x13c   : > { %v3846_v59 = vpop.f32.mrf.mxu0  ;;  %v3870_v1 = vpop.f32.mrf.mxu1 }
 0x13d   : > { %v1108_v27 = vadd.f32 %v3846_v59, %v950_v43 }
 0x13e   : > { %v1075_v61 = vpop.f32.mrf.mxu0  ;;  %v1233_v3 = vpop.f32.mrf.mxu1 }
 0x13f   : > { %v1266_v21 = vadd.f32 %v3870_v1, %v1108_v27 }
 0x140   : > { %v3847_v63 = vpop.f32.mrf.mxu0  ;;  %v3871_v5 = vpop.f32.mrf.mxu1 }
 0x141   : > { %v1109_v28 = vadd.f32 %v3847_v63, %v951_v31 }
 0x142   : > { %v1078_v2 = vpop.f32.mrf.mxu0  ;;  %v1236_v7 = vpop.f32.mrf.mxu1 }
 0x143   : > { %v1267_v53 = vadd.f32 %v3871_v5, %v1109_v28 }
 0x144   : > { %v3850_v4 = vpop.f32.mrf.mxu0  ;;  %v3874_v9 = vpop.f32.mrf.mxu1 }
 0x145   : > { %v1112_v18 = vadd.f32 %v3850_v4, %v954_v49 }
 0x146   : > { %v1091_v6 = vpop.f32.mrf.mxu0  ;;  %v1249_v12 = vpop.f32.mrf.mxu1 }
 0x148   : > { %v3851_v8 = vpop.f32.mrf.mxu0  ;;  %v4799_v14 = vpop.f32.mrf.mxu1 }
 0x149   : > { %5311 = vst [vmem:[#allocation6_spill] sm:$0xff] %v4799_v14  ;;  %v1113_v48 = vadd.f32 %v3851_v8, %v955_v36 }
 0x14a   : > { %v4797_v10 = vpop.f32.mrf.mxu0  ;;  %v4801_v16 = vpop.f32.mrf.mxu1 }
 0x14b   : > { %5310 = vst [vmem:[#allocation5_spill] sm:$0xff] %v4797_v10  ;;  %5312 = vst [vmem:[#allocation7_spill] sm:$0xff] %v4801_v16  ;;  %v948_v16 = vadd.f32 %v917_v51, %v791_v29  ;;  %v627_v10 = vadd.f32 %v626_v42, %v4774_v33  ;;  %v1107_v51 = vadd.f32 %v1078_v2, %v949_v44 }
 0x14c   : > { %v796_v42 = vadd.f32 %v779_v58, %v630_v47 }
 0x14d   : > { %v1106_v17 = vadd.f32 %v1075_v61, %v948_v16  ;;  %v795_v34 = vadd.f32 %v776_v54, %v627_v10  ;;  %v1265_v55 = vadd.f32 %v1236_v7, %v1107_v51 }
 0x14e   : > { %v953_v40 = vadd.f32 %v4795_v0, %v796_v42 }
 0x14f   : > { %v1264_v50 = vadd.f32 %v1233_v3, %v1106_v17  ;;  %v952_v33 = vadd.f32 %v933_v60, %v795_v34  ;;  %v1270_v60 = vadd.f32 %v3874_v9, %v1112_v18 }
 0x150   : > { %v5314_v8 = vld [vmem:[#allocation6_spill] sm:$0xff] }
 0x151   : > { %v1110_v45 = vadd.f32 %v1091_v6, %v952_v33 }
 0x152   : > { %v5313_v62 = vld [vmem:[#allocation5_spill] sm:$0xff] }
 0x153   : > { %v1268_v5 = vadd.f32 %v1249_v12, %v1110_v45  ;;  %v1111_v6 = vadd.f32 %v5313_v62, %v953_v40  ;;  %v5315_v12 = vld [vmem:[#allocation7_spill] sm:$0xff] }
 0x15c   : > { %v3894_v11 = vpop.f32.mrf.mxu0  ;;  %v3918_v19 = vpop.f32.mrf.mxu1 }
 0x15d   : > { %v1424_v59 = vadd.f32 %v3894_v11, %v1266_v21 }
 0x15e   : > { %v1391_v13 = vpop.f32.mrf.mxu0  ;;  %v1549_v32 = vpop.f32.mrf.mxu1 }
 0x15f   : > { %v1422_v52 = vadd.f32 %v1391_v13, %v1264_v50  ;;  %v1582_v63 = vadd.f32 %v3918_v19, %v1424_v59 }
 0x160   : > { %v3895_v15 = vpop.f32.mrf.mxu0  ;;  %v3919_v14 = vpop.f32.mrf.mxu1 }
 0x161   : > { %v1425_v1 = vadd.f32 %v3895_v15, %v1267_v53  ;;  %v1580_v58 = vadd.f32 %v1549_v32, %v1422_v52  ;;  %v1271_v15 = vadd.f32 %v5314_v8, %v1113_v48  ;;  %v1269_v32 = vadd.f32 %v5315_v12, %v1111_v6 }
 0x162   : > { %v1394_v20 = vpop.f32.mrf.mxu0  ;;  %v1552_v37 = vpop.f32.mrf.mxu1 }
 0x163   : > { %v1423_v2 = vadd.f32 %v1394_v20, %v1265_v55  ;;  %v1583_v7 = vadd.f32 %v3919_v14, %v1425_v1 }
 0x164   : > { %v3898_v35 = vpop.f32.mrf.mxu0  ;;  %v3922_v61 = vpop.f32.mrf.mxu1 }
 0x165   : > { %v1428_v11 = vadd.f32 %v3898_v35, %v1270_v60  ;;  %v1581_v24 = vadd.f32 %v1552_v37, %v1423_v2 }
 0x166   : > { %v1407_v23 = vpop.f32.mrf.mxu0  ;;  %v1565_v3 = vpop.f32.mrf.mxu1 }
 0x167   : > { %v1426_v16 = vadd.f32 %v1407_v23, %v1268_v5  ;;  %v1586_v14 = vadd.f32 %v3922_v61, %v1428_v11 }
 0x168   : > { %v3899_v38 = vpop.f32.mrf.mxu0  ;;  %v3923_v26 = vpop.f32.mrf.mxu1 }
 0x169   : > { %v1429_v39 = vadd.f32 %v3899_v38, %v1271_v15  ;;  %v1584_v27 = vadd.f32 %v1565_v3, %v1426_v16 }
 0x16a   : > { %v1410_v54 = vpop.f32.mrf.mxu0  ;;  %v1568_v41 = vpop.f32.mrf.mxu1 }
 0x16b   : > { %v1427_v31 = vadd.f32 %v1410_v54, %v1269_v32  ;;  %v1587_v44 = vadd.f32 %v3923_v26, %v1429_v39 }
 0x16d   : > { %v1585_v30 = vadd.f32 %v1568_v41, %v1427_v31  ;;  %v4174_v31 = vld [vmem:[%s5294_s2 + $0x58] sm:$0xff]   ;;  %v4176_v41 = vld [vmem:[%s5294_s2 + $0x48] sm:$0xff]  }
 0x17c   : > { %v3942_v56 = vpop.f32.mrf.mxu0 }
 0x17d   : > { %v1740_v4 = vadd.f32 %v3942_v56, %v1582_v63 }
 0x17e   : > { %v1707_v10 = vpop.f32.mrf.mxu0 }
 0x17f   : > { %v4819_v13 = vadd.f32 %v3390_v57, %v1740_v4  ;;  %v1738_v0 = vadd.f32 %v1707_v10, %v1580_v58 }
 0x180   : > { %v3943_v19 = vpop.f32.mrf.mxu0 }
 0x181   : > { %v3393_v9 = vmul.f32 -1.442695, %v4819_v13  ;;  %v4823_v20 = vadd.f32 %v3390_v57, %v1738_v0  ;;  %v1741_v29 = vadd.f32 %v3943_v19, %v1583_v7 }
 0x182   : > { %v1710_v43 = vpop.f32.mrf.mxu0 }
 0x183   : > { %v3391_v35 = vmul.f32 -1.442695, %v4823_v20  ;;  %v1754_v46 = vadd.f32 %v3390_v57, %v1741_v29  ;;  %v1739_v22 = vadd.f32 %v1710_v43, %v1581_v24  ;;  %4210 = vpow2.f32 %v3393_v9 }
 0x184   : > { %v3946_v23 = vpop.f32.mrf.mxu0 }
 0x185   : > { %4212 = vpow2.f32 %v3391_v35  ;;  %v3394_v17 = vmul.f32 -1.442695, %v1754_v46  ;;  %v1752_v25 = vadd.f32 %v3390_v57, %v1739_v22  ;;  %v1744_v34 = vadd.f32 %v3946_v23, %v1586_v14  ;;  %v4170_v14 = vld [vmem:[%s5294_s2 + $0x78] sm:$0xff]   ;;  %v5324_v35 = vld [vmem:[#allocation4_spill] sm:$0xff]  ;;  %v4172_v22 = vld [vmem:[%s5294_s2 + $0x68] sm:$0xff]  }
 0x186   : > { %v1723_v21 = vpop.f32.mrf.mxu0  ;;  %3988 = vmatprep.mubr.msk.bf16.mxu0 %vm4357_vm0, %v5324_v35  ;;  %3973 = vmatpush3.bf16.msra.mxu0 %v4170_v14  ;;  %v4175_v23 = vld [vmem:[%s5294_s2 + $0x50] sm:$0xff]  }
 0x187   : > { %4214 = vpow2.f32 %v3394_v17  ;;  %v3392_v28 = vmul.f32 -1.442695, %v1752_v25  ;;  %v1757_v37 = vadd.f32 %v3390_v57, %v1744_v34  ;;  %v1742_v47 = vadd.f32 %v1723_v21, %v1584_v27  ;;  %3974 = vmatprep.subr.bf16.mxu0 %v5324_v35  ;;  %v4173_v27 = vld [vmem:[%s5294_s2 + $0x60] sm:$0xff]  }
 0x188   : > { %v3947_v38 = vpop.f32.mrf.mxu0  ;;  %v4177_v17 = vld [vmem:[%s5294_s2 + $0x40] sm:$0xff]  }
 0x189   : > { %4216 = vpow2.f32 %v3392_v28  ;;  %v3397_v49 = vmul.f32 -1.442695, %v1757_v37  ;;  %v1755_v50 = vadd.f32 %v3390_v57, %v1742_v47  ;;  %v1745_v51 = vadd.f32 %v3947_v38, %v1587_v44 }
 0x18a   : > { %v1726_v59 = vpop.f32.mrf.mxu0 }
 0x18b   : > { %v3395_v33 = vmul.f32 -1.442695, %v1755_v50  ;;  %v1758_v42 = vadd.f32 %v3390_v57, %v1745_v51  ;;  %v1743_v53 = vadd.f32 %v1726_v59, %v1585_v30  ;;  %4218 = vpow2.f32 %v3397_v49 }
 0x18d   : > { %4220 = vpow2.f32 %v3395_v33  ;;  %v3398_v18 = vmul.f32 -1.442695, %v1758_v42  ;;  %v1756_v52 = vadd.f32 %v3390_v57, %v1743_v53 }
 0x18f   : > { %4222 = vpow2.f32 %v3398_v18  ;;  %v3396_v61 = vmul.f32 -1.442695, %v1756_v52 }
 0x190   : > { %v4211_v36 = vpop.eup %4210 }
 0x191   : > { %4224 = vpow2.f32 %v3396_v61  ;;  %v1785_v63 = vadd.f32 1.0, %v4211_v36 }
 0x192   : > { %v4213_v45 = vpop.eup %4212 }
 0x193   : > { %v1783_v54 = vadd.f32 1.0, %v4213_v45 }
 0x194   : > { %v4215_v55 = vpop.eup %4214 }
 0x195   : > { %v1786_v1 = vadd.f32 1.0, %v4215_v55  ;;  %4226 = vrcp.f32 %v1783_v54 }
 0x196   : > { %v4217_v40 = vpop.eup %4216 }
 0x197   : > { %4228 = vrcp.f32 %v1786_v1  ;;  %v1784_v48 = vadd.f32 1.0, %v4217_v40 }
 0x198   : > { %4230 = vrcp.f32 %v1785_v63  ;;  %v4219_v56 = vpop.eup %4218 }
 0x199   : > { %4232 = vrcp.f32 %v1784_v48  ;;  %v1789_v57 = vadd.f32 1.0, %v4219_v56  ;;  %v2048_v56 = vlaneseq }
 0x19a   : > { %v4221_v60 = vpop.eup %4220 }
 0x19b   : > { %v1787_v58 = vadd.f32 1.0, %v4221_v60 }
 0x19c   : > { %v4223_v2 = vpop.eup %4222 }
 0x19d   : > { %v1790_v3 = vadd.f32 1.0, %v4223_v2  ;;  %4234 = vrcp.f32 %v1787_v58 }
 0x19e   : > { %v4225_v4 = vpop.eup %4224 }
 0x19f   : > { %4236 = vrcp.f32 %v1790_v3  ;;  %v1788_v5 = vadd.f32 1.0, %v4225_v4 }
 0x1a0   : > { %4238 = vrcp.f32 %v1789_v57  ;;  %v2049_v57 = vshrl.u32 %v2048_v56, 7 }
 0x1a1   : > { %4240 = vrcp.f32 %v1788_v5 }
 0x1a2   : > { %v4227_v62 = vpop.eup %4226  ;;  %v4915_v5 = vsub.s32 0, %v2049_v57 }
 0x1a3   : > { %v4830_v0 = vmul.f32 %v4227_v62, %v4823_v20 }
 0x1a4   : > { %v4229_v6 = vpop.eup %4228 }
 0x1a5   : > { %v4231_v10 = vpop.eup %4230  ;;  %v4827_v11 = vmul.f32 %v4229_v6, %v1754_v46  ;;  %5317 = vst [vmem:[#allocation6_spill] sm:$0xff] %v4830_v0  ;;  %v4171_v46 = vld [vmem:[%s5294_s2 + $0x70] sm:$0xff]  }
 0x1a6   : > { %v4233_v7 = vpop.eup %4232  ;;  %v4835_v15 = vmul.f32 %v4231_v10, %v4819_v13  ;;  %3975 = vmatpush3.bf16.msra.mxu0 %v4171_v46  ;;  %v2078_v10 = vsub.s32 1, %v2049_v57 }
 0x1a7   : > { %5316 = vst [vmem:[#allocation5_spill] sm:$0xff] %v4827_v11  ;;  %v4832_v8 = vmul.f32 %v4233_v7, %v1752_v25  ;;  %3976 = vmatprep.subr.bf16.mxu0 %v5324_v35  ;;  %v3399_v25 = vld [vmem:[%s5296_s4 + $0x1] ss:$0 sm:$0xff] }
 0x1a8   : > { %5319 = vst [vmem:[#allocation8_spill] sm:$0xff] %v4835_v15  ;;  %v1816_v19 = vpack.c.bf16 %v4827_v11, %v4835_v15 }
 0x1a9   : > { %5318 = vst [vmem:[#allocation7_spill] sm:$0xff] %v4832_v8  ;;  %v1815_v16 = vpack.c.bf16 %v4832_v8, %v4830_v0 }
 0x1aa   : > { %v4235_v24 = vpop.eup %4234  ;;  %3977 = vmatpush3.bf16.msra.mxu0 %v4172_v22 }
 0x1ab   : > { %3964 = vmatprep.mubr.bf16.mxu1 %v1815_v16  ;;  %v4843_v20 = vmul.f32 %v4235_v24, %v1755_v50  ;;  %3978 = vmatprep.subr.bf16.mxu0 %v5324_v35 }
 0x1ac   : > { %v4237_v26 = vpop.eup %4236  ;;  %3965 = vmatmul.mubr.bf16.vlgmr.msra.gmra.mxu1 %v1816_v19  ;;  %v2038_v19 = vld [vmem:[%s5295_s3] sm:$0xff] }
 0x1ad   : > { %v4239_v9 = vpop.eup %4238  ;;  %v4841_v12 = vmul.f32 %v4237_v26, %v1758_v42  ;;  %5321 = vst [vmem:[#allocation10_spill] sm:$0xff] %v4843_v20  ;;  %v4921_v24 = vrot.slane %v2038_v19, %v4915_v5  ;;  %v2106_v26 = vsub.s32 2, %v2049_v57 }
 0x1ae   : > { %v4241_v29 = vpop.eup %4240  ;;  %v4847_v13 = vmul.f32 %v4239_v9, %v1757_v37  ;;  %3979 = vmatpush3.bf16.msra.mxu0 %v4173_v27 }
 0x1af   : > { %5320 = vst [vmem:[#allocation9_spill] sm:$0xff] %v4841_v12  ;;  %v4845_v32 = vmul.f32 %v4241_v29, %v1756_v52  ;;  %3980 = vmatprep.subr.bf16.mxu0 %v5324_v35  ;;  %v4925_v22 = vrot.slane %v2038_v19, %v2106_v26  ;;  %v2052_v27 = vmul.f32 %v5324_v35, %v4921_v24 }
 0x1b0   : > { %5323 = vst [vmem:[#allocation12_spill] sm:$0xff] %v4847_v13  ;;  %v1818_v43 = vpack.c.bf16 %v4841_v12, %v4847_v13 }
 0x1b1   : > { %5322 = vst [vmem:[#allocation11_spill] sm:$0xff] %v4845_v32  ;;  %v1817_v39 = vpack.c.bf16 %v4845_v32, %v4843_v20 }
 0x1b2   : > { %3981 = vmatpush3.bf16.msra.mxu0 %v4174_v31 }
 0x1b3   : > { %3968 = vmatprep.mubr.bf16.mxu1 %v1817_v39  ;;  %3982 = vmatprep.subr.bf16.mxu0 %v5324_v35  ;;  %v2068_v39 = vld [vmem:[#allocation3 + $0x1] sm:$0xff] }
 0x1b4   : > { %3969 = vmatmul.mubr.bf16.gmra.mxu1 %v1818_v43  ;;  %v4923_v43 = vrot.slane %v2038_v19, %v2078_v10 }
 0x1b5   : > { %4008 = vmatprep.mubr.msk.bf16.mxu1 %vm4357_vm0, %v5324_v35 }
 0x1b6   : > { %3983 = vmatpush3.bf16.msra.mxu0 %v4175_v23  ;;  %v2080_v31 = vmul.f32 %v4923_v43, %v2068_v39 }
 0x1b7   : > { %3984 = vmatprep.subr.bf16.mxu0 %v5324_v35 }
 0x1ba   : > { %3985 = vmatpush3.bf16.msra.mxu0 %v4176_v41  ;;  %v2162_v41 = vsub.s32 4, %v2049_v57 }
 0x1bb   : > { %3986 = vmatprep.subr.bf16.mxu0 %v5324_v35 }
 0x1be   : > { %3987 = vmatpush3.bf16.msra.mxu0 %v4177_v17  ;;  %v2247_v17 = vsub.s32 7, %v2049_v57 }
 0x26c   : > { %v3966_v34 = vpop.f32.mrf.mxu1 }
 0x26d   : > { %v4891_v44 = vadd.f32 %v3966_v34, %v3399_v25 }
 0x26e   : > { %v1922_v21 = vpop.f32.mrf.mxu1 }
 0x26f   : > { %v3410_v28 = vmul.f32 -1.442695, %v4891_v44  ;;  %v4894_v37 = vadd.f32 %v3399_v25, %v1922_v21 }
 0x270   : > { %v3967_v47 = vpop.f32.mrf.mxu1 }
 0x271   : > { %4242 = vpow2.f32 %v3410_v28  ;;  %v3408_v30 = vmul.f32 -1.442695, %v4894_v37  ;;  %v4897_v38 = vadd.f32 %v3967_v47, %v3399_v25  ;;  %v2219_v28 = vsub.s32 6, %v2049_v57 }
 0x272   : > { %v1925_v49 = vpop.f32.mrf.mxu1 }
 0x273   : > { %4244 = vpow2.f32 %v3408_v30  ;;  %v3411_v50 = vmul.f32 -1.442695, %v4897_v38  ;;  %v4900_v51 = vadd.f32 %v3399_v25, %v1925_v49  ;;  %v2134_v30 = vsub.s32 3, %v2049_v57 }
 0x274   : > { %v3970_v59 = vpop.f32.mrf.mxu1  ;;  %v2190_v49 = vsub.s32 5, %v2049_v57 }
 0x275   : > { %4246 = vpow2.f32 %v3411_v50  ;;  %v3409_v33 = vmul.f32 -1.442695, %v4900_v51  ;;  %v4903_v42 = vadd.f32 %v3970_v59, %v3399_v25  ;;  %v2088_v59 = vadd.f32 %v2080_v31, %v2052_v27 }
 0x276   : > { %v1938_v53 = vpop.f32.mrf.mxu1 }
 0x277   : > { %4248 = vpow2.f32 %v3409_v33  ;;  %v3414_v18 = vmul.f32 -1.442695, %v4903_v42  ;;  %v4906_v52 = vadd.f32 %v3399_v25, %v1938_v53 }
 0x278   : > { %v3971_v61 = vpop.f32.mrf.mxu1 }
 0x279   : > { %4250 = vpow2.f32 %v3414_v18  ;;  %v3412_v36 = vmul.f32 -1.442695, %v4906_v52  ;;  %v4909_v45 = vadd.f32 %v3971_v61, %v3399_v25  ;;  %v4933_v18 = vrot.slane %v2038_v19, %v2162_v41 }
 0x27a   : > { %v1941_v54 = vpop.f32.mrf.mxu1  ;;  %v4935_v61 = vrot.slane %v2038_v19, %v2247_v17 }
 0x27b   : > { %4252 = vpow2.f32 %v3412_v36  ;;  %v3415_v55 = vmul.f32 -1.442695, %v4909_v45  ;;  %v4912_v63 = vadd.f32 %v3399_v25, %v1941_v54  ;;  %v2096_v25 = vld [vmem:[#allocation3 + $0x2] sm:$0xff]  ;;  %v2244_v36 = vld [vmem:[#allocation3 + $0x91] sm:$0xff]  ;;  %v4937_v54 = vrot.slane %v2038_v19, %v2219_v28 }
 0x27c   : > { %v2108_v33 = vmul.f32 %v4925_v22, %v2096_v25 }
 0x27d   : > { %4254 = vpow2.f32 %v3415_v55  ;;  %v3413_v1 = vmul.f32 -1.442695, %v4912_v63  ;;  %v2272_v55 = vld [vmem:[#allocation3 + $0x92] sm:$0xff] }
 0x27e   : > { %v4243_v40 = vpop.eup %4242 }
 0x27f   : > { %v1979_v48 = vadd.f32 1.0, %v4243_v40  ;;  %4256 = vpow2.f32 %v3413_v1  ;;  %v4940_v40 = vrot.slane %v2038_v19, %v2134_v30 }
 0x280   : > { %v4245_v60 = vpop.eup %4244 }
 0x281   : > { %4258 = vrcp.f32 %v1979_v48  ;;  %v1977_v58 = vadd.f32 1.0, %v4245_v60  ;;  %v2116_v48 = vadd.f32 %v2108_v33, %v2088_v59  ;;  %v4948_v60 = vld [vmem:[%s5295_s3 + $0x8] ss:$0 sm:$0xff] }
 0x282   : > { %v4247_v2 = vpop.eup %4246 }
 0x283   : > { %4260 = vrcp.f32 %v1977_v58  ;;  %v1980_v3 = vadd.f32 1.0, %v4247_v2  ;;  %v4952_v58 = vmul.f32 %v5324_v35, %v4937_v54 }
 0x284   : > { %v4249_v4 = vpop.eup %4248 }
 0x285   : > { %4262 = vrcp.f32 %v1980_v3  ;;  %v1978_v62 = vadd.f32 1.0, %v4249_v4  ;;  %v4965_v4 = vmul.f32 %v4948_v60, %v2272_v55 }
 0x286   : > { %v4251_v6 = vpop.eup %4250 }
 0x287   : > { %4264 = vrcp.f32 %v1978_v62  ;;  %v1983_v7 = vadd.f32 1.0, %v4251_v6 }
 0x288   : > { %v4253_v16 = vpop.eup %4252 }
 0x289   : > { %4266 = vrcp.f32 %v1983_v7  ;;  %v1981_v9 = vadd.f32 1.0, %v4253_v16 }
 0x28a   : > { %v4255_v29 = vpop.eup %4254 }
 0x28b   : > { %4268 = vrcp.f32 %v1981_v9  ;;  %v1984_v14 = vadd.f32 1.0, %v4255_v29 }
 0x28c   : > { %v4257_v46 = vpop.eup %4256 }
 0x28d   : > { %4270 = vrcp.f32 %v1984_v14  ;;  %v1982_v34 = vadd.f32 1.0, %v4257_v46 }
 0x28e   : > { %v4259_v23 = vpop.eup %4258 }
 0x28f   : > { %v2003_v21 = vmul.f32 %v4259_v23, %v4891_v44  ;;  %4272 = vrcp.f32 %v1982_v34 }
 0x290   : > { %v4261_v47 = vpop.eup %4260 }
 0x291   : > { %2032 = vst [vmem:[#allocation3 + $0x31] sm:$0xff] %v2003_v21  ;;  %v2001_v50 = vmul.f32 %v4261_v47, %v4894_v37  ;;  %v4942_v37 = vrot.slane %v2038_v19, %v2190_v49  ;;  %v2083_v57 = vmul.f32 %v4923_v43, %v2003_v21  ;;  %v4959_v3 = vmul.f32 %v4933_v18, %v2003_v21 }
 0x292   : > { %v4263_v53 = vpop.eup %4262 }
 0x293   : > { %2030 = vst [vmem:[#allocation3 + $0x11] sm:$0xff] %v2001_v50  ;;  %v2004_v44 = vmul.f32 %v4263_v53, %v4897_v38  ;;  %v4955_v38 = vmul.f32 %v4935_v61, %v2244_v36  ;;  %v2081_v62 = vmul.f32 %v4923_v43, %v2001_v50  ;;  %v2164_v35 = vmul.f32 %v4933_v18, %v2001_v50 }
 0x294   : > { %v4265_v1 = vpop.eup %4264 }
 0x295   : > { %2033 = vst [vmem:[#allocation3 + $0x41] sm:$0xff] %v2004_v44  ;;  %v2002_v56 = vmul.f32 %v4265_v1, %v4900_v51  ;;  %v4962_v51 = vmul.f32 %v4935_v61, %v2003_v21  ;;  %v2084_v6 = vmul.f32 %v4923_v43, %v2004_v44  ;;  %v4976_v26 = vmul.f32 %v4933_v18, %v2004_v44 }
 0x296   : > { %v4267_v2 = vpop.eup %4266  ;;  %v4981_v39 = vmul.f32 %v4935_v61, %v2004_v44 }
 0x297   : > { %2031 = vst [vmem:[#allocation3 + $0x21] sm:$0xff] %v2002_v56  ;;  %v4971_v10 = vmul.f32 %v4267_v2, %v4903_v42  ;;  %v2082_v9 = vmul.f32 %v4923_v43, %v2002_v56  ;;  %v2165_v29 = vmul.f32 %v4933_v18, %v2002_v56  ;;  %v4988_v27 = vmul.f32 %v4935_v61, %v2002_v56 }
 0x298   : > { %v4269_v7 = vpop.eup %4268  ;;  %v2043_v16 = vld [vmem:[#allocation3 + $0x30] sm:$0xff] }
 0x299   : > { %v4973_v19 = vld [vmem:[#allocation3 + $0x32] sm:$0xff]  ;;  %v2055_v14 = vmul.f32 %v4921_v24, %v2043_v16  ;;  %v2138_v46 = vmul.f32 %v4940_v40, %v2043_v16  ;;  %2036 = vst [vmem:[#allocation3 + $0x71] sm:$0xff] %v4971_v10  ;;  %v4996_v41 = vmul.f32 %v4937_v54, %v2043_v16  ;;  %v2087_v34 = vmul.f32 %v4923_v43, %v4971_v10 }
 0x29a   : > { %v2111_v42 = vmul.f32 %v4925_v22, %v4973_v19  ;;  %v4271_v31 = vpop.eup %4270  ;;  %v4993_v23 = vmul.f32 %v4942_v37, %v4973_v19  ;;  %v2041_v17 = vld [vmem:[#allocation3 + $0x10] sm:$0xff]  ;;  %v5001_v21 = vmul.f32 %v4269_v7, %v4906_v52  ;;  %v5007_v49 = vmul.f32 %v4933_v18, %v4971_v10 }
 0x29b   : > { %v2097_v25 = vld [vmem:[#allocation3 + $0x12] sm:$0xff]  ;;  %v2091_v28 = vadd.f32 %v2083_v57, %v2055_v14  ;;  %v2053_v47 = vmul.f32 %v4921_v24, %v2041_v17  ;;  %v2136_v30 = vmul.f32 %v4940_v40, %v2041_v17  ;;  %v5017_v36 = vmul.f32 %v4271_v31, %v4909_v45 }
 0x29c   : > { %v2109_v50 = vmul.f32 %v4925_v22, %v2097_v25  ;;  %v2192_v59 = vmul.f32 %v4942_v37, %v2097_v25  ;;  %v2044_v33 = vld [vmem:[#allocation3 + $0x40] sm:$0xff]  ;;  %2034 = vst [vmem:[#allocation3 + $0x51] sm:$0xff] %v5001_v21  ;;  %v2085_v52 = vmul.f32 %v4923_v43, %v5001_v21  ;;  %v2168_v45 = vmul.f32 %v4933_v18, %v5001_v21 }
 0x29d   : > { %v5011_v53 = vld [vmem:[#allocation3 + $0x42] sm:$0xff]  ;;  %v2119_v44 = vadd.f32 %v2111_v42, %v2091_v28  ;;  %v2089_v55 = vadd.f32 %v2081_v62, %v2053_v47  ;;  %v2144_v1 = vadd.f32 %v2136_v30, %v2116_v48  ;;  %v2056_v56 = vmul.f32 %v4921_v24, %v2044_v33  ;;  %2037 = vst [vmem:[#allocation3 + $0x81] sm:$0xff] %v5017_v36  ;;  %v4273_v62 = vpop.eup %4272 }
 0x29e   : > { %v2112_v2 = vmul.f32 %v4925_v22, %v5011_v53  ;;  %v2139_v57 = vmul.f32 %v4940_v40, %v2044_v33  ;;  %v2195_v7 = vmul.f32 %v4942_v37, %v5011_v53  ;;  %v2042_v16 = vld [vmem:[#allocation3 + $0x20] sm:$0xff]  ;;  %v2223_v28 = vmul.f32 %v4937_v54, %v2044_v33 }
 0x29f   : > { %v5025_v14 = vld [vmem:[#allocation3 + $0x22] sm:$0xff]  ;;  %v2117_v48 = vadd.f32 %v2109_v50, %v2089_v55  ;;  %v2172_v42 = vadd.f32 %v2164_v35, %v2144_v1  ;;  %v2092_v31 = vadd.f32 %v2084_v6, %v2056_v56  ;;  %v2054_v17 = vmul.f32 %v4921_v24, %v2042_v16 }
 0x2a0   : > { %v2147_v25 = vadd.f32 %v2139_v57, %v2119_v44  ;;  %v2110_v47 = vmul.f32 %v4925_v22, %v5025_v14  ;;  %v2137_v30 = vmul.f32 %v4940_v40, %v2042_v16  ;;  %v2047_v13 = vld [vmem:[#allocation3 + $0x70] sm:$0xff]  ;;  %v2193_v35 = vmul.f32 %v4942_v37, %v5025_v14 }
 0x2a1   : > { %v5035_v32 = vld [vmem:[#allocation3 + $0x72] sm:$0xff]  ;;  %v2200_v20 = vadd.f32 %v2192_v59, %v2172_v42  ;;  %v2120_v12 = vadd.f32 %v2112_v2, %v2092_v31  ;;  %v2090_v15 = vadd.f32 %v2082_v9, %v2054_v17  ;;  %v2221_v50 = vmul.f32 %v4937_v54, %v2042_v16 }
 0x2a2   : > { %v2145_v6 = vadd.f32 %v2137_v30, %v2117_v48  ;;  %v2059_v44 = vmul.f32 %v4921_v24, %v2047_v13  ;;  %v2006_v33 = vmul.f32 %v4273_v62, %v4912_v63  ;;  %v2115_v57 = vmul.f32 %v4925_v22, %v5035_v32 }
 0x2a3   : > { %v2118_v55 = vadd.f32 %v2110_v47, %v2090_v15  ;;  %v2045_v1 = vld [vmem:[#allocation3 + $0x50] sm:$0xff]  ;;  %v5047_v59 = vmul.f32 %v4940_v40, %v2047_v13  ;;  %v2171_v9 = vmul.f32 %v4933_v18, %v5017_v36  ;;  %v2175_v15 = vadd.f32 %v4976_v26, %v2147_v25 }
 0x2a4   : > { %v5042_v56 = vld [vmem:[#allocation3 + $0x52] sm:$0xff]  ;;  %v2173_v2 = vadd.f32 %v2165_v29, %v2145_v6  ;;  %v2057_v16 = vmul.f32 %v4921_v24, %v2045_v1  ;;  %v2140_v48 = vmul.f32 %v4940_v40, %v2045_v1  ;;  %2035 = vst [vmem:[#allocation3 + $0x61] sm:$0xff] %v2006_v33  ;;  %v2086_v42 = vmul.f32 %v4923_v43, %v2006_v33  ;;  %v2131_v17 = vld [vmem:[#allocation3 + $0x80] sm:$0xff] }
 0x2a5   : > { %v2146_v63 = vadd.f32 %v2138_v46, %v2118_v55  ;;  %v2113_v62 = vmul.f32 %v4925_v22, %v5042_v56  ;;  %v2095_v31 = vadd.f32 %v2087_v34, %v2059_v44  ;;  %v2143_v30 = vmul.f32 %v4940_v40, %v2131_v17  ;;  %v5059_v6 = vld [vmem:[#allocation3 + $0x82] sm:$0xff] }
 0x2a6   : > { %v2093_v47 = vadd.f32 %v2085_v52, %v2057_v16  ;;  %v2148_v8 = vadd.f32 %v2140_v48, %v2120_v12  ;;  %v2169_v29 = vmul.f32 %v4933_v18, %v2006_v33  ;;  %v2201_v0 = vadd.f32 %v2193_v35, %v2173_v2 }
 0x2a7   : > { %v2123_v11 = vadd.f32 %v2115_v57, %v2095_v31  ;;  %v2174_v26 = vadd.f32 %v4959_v3, %v2146_v63  ;;  %v2196_v46 = vmul.f32 %v4942_v37, %v5042_v56  ;;  %v2198_v43 = vmul.f32 %v4942_v37, %v5035_v32 }
 0x2a8   : > { %v2121_v25 = vadd.f32 %v2113_v62, %v2093_v47  ;;  %v2176_v55 = vadd.f32 %v2168_v45, %v2148_v8  ;;  %v2203_v34 = vadd.f32 %v2195_v7, %v2175_v15  ;;  %v2199_v12 = vmul.f32 %v4942_v37, %v5059_v6 }
 0x2a9   : > { %v2151_v52 = vadd.f32 %v2143_v30, %v2123_v11  ;;  %v2202_v18 = vadd.f32 %v4993_v23, %v2174_v26  ;;  %v2224_v35 = vmul.f32 %v4937_v54, %v2045_v1  ;;  %v2226_v3 = vmul.f32 %v4937_v54, %v2047_v13 }
 0x2aa   : > { %v2204_v44 = vadd.f32 %v2196_v46, %v2176_v55  ;;  %v2227_v57 = vmul.f32 %v4937_v54, %v2131_v17  ;;  %v2229_v2 = vadd.f32 %v2221_v50, %v2200_v20  ;;  %v2230_v48 = vadd.f32 %v4996_v41, %v2201_v0 }
 0x2ab   : > { %v2046_v16 = vld [vmem:[#allocation3 + $0x60] sm:$0xff]  ;;  %v2179_v45 = vadd.f32 %v2171_v9, %v2151_v52  ;;  %v2231_v7 = vadd.f32 %v2223_v28, %v2202_v18  ;;  %v2232_v11 = vadd.f32 %v2224_v35, %v2203_v34  ;;  %v2252_v1 = vmul.f32 %v4935_v61, %v5001_v21 }
 0x2ac   : > { %v2102_v8 = vld [vmem:[#allocation3 + $0x62] sm:$0xff]  ;;  %v2058_v15 = vmul.f32 %v4921_v24, %v2046_v16  ;;  %v2141_v23 = vmul.f32 %v4940_v40, %v2046_v16  ;;  %v2225_v20 = vmul.f32 %v4937_v54, %v2046_v16  ;;  %v2253_v50 = vmul.f32 %v4935_v61, %v2006_v33 }
 0x2ad   : > { %v2114_v63 = vmul.f32 %v4925_v22, %v2102_v8  ;;  %v2197_v13 = vmul.f32 %v4942_v37, %v2102_v8  ;;  %v2207_v62 = vadd.f32 %v2199_v12, %v2179_v45  ;;  %v2254_v41 = vmul.f32 %v4935_v61, %v4971_v10 }
 0x2ae   : > { %v2094_v9 = vadd.f32 %v2086_v42, %v2058_v15  ;;  %v2149_v0 = vadd.f32 %v2141_v23, %v2121_v25  ;;  %v2255_v24 = vmul.f32 %v4935_v61, %v5017_v36  ;;  %v2233_v22 = vadd.f32 %v2225_v20, %v2204_v44 }
 0x2af   : > { %v2236_v40 = vadd.f32 %v4952_v58, %v2207_v62  ;;  %v2257_v21 = vadd.f32 %v4988_v27, %v2229_v2  ;;  %v2258_v37 = vadd.f32 %v4962_v51, %v2230_v48  ;;  %v2259_v54 = vadd.f32 %v4981_v39, %v2231_v7  ;;  %v3417_v39 = vld [vmem:[%s5296_s4 + $0x2] ss:$0 sm:$0xff] }
 0x2b0   : > { %v2122_v28 = vadd.f32 %v2114_v63, %v2094_v9  ;;  %v2177_v31 = vadd.f32 %v2169_v29, %v2149_v0  ;;  %v2260_v33 = vadd.f32 %v2252_v1, %v2232_v11  ;;  %v2261_v42 = vadd.f32 %v2253_v50, %v2233_v22 }
 0x2b1   : > { %v2264_v17 = vadd.f32 %v4955_v38, %v2236_v40  ;;  %v2277_v10 = vmul.f32 %v4948_v60, %v5025_v14  ;;  %v2278_v61 = vmul.f32 %v4948_v60, %v4973_v19  ;;  %v2279_v51 = vmul.f32 %v4948_v60, %v5011_v53 }
 0x2b2   : > { %v2150_v58 = vadd.f32 %v5047_v59, %v2122_v28  ;;  %v2205_v36 = vadd.f32 %v2197_v13, %v2177_v31  ;;  %v2280_v27 = vmul.f32 %v4948_v60, %v5042_v56  ;;  %v2281_v38 = vmul.f32 %v4948_v60, %v2102_v8 }
 0x2b3   : > { %v2282_v14 = vmul.f32 %v4948_v60, %v5035_v32  ;;  %v2285_v47 = vadd.f32 %v2277_v10, %v2257_v21  ;;  %v2286_v19 = vadd.f32 %v2278_v61, %v2258_v37  ;;  %v2287_v29 = vadd.f32 %v2279_v51, %v2259_v54 }
 0x2b4   : > { %v2178_v59 = vadd.f32 %v5007_v49, %v2150_v58  ;;  %v2234_v30 = vadd.f32 %v2226_v3, %v2205_v36  ;;  %v2288_v26 = vadd.f32 %v2280_v27, %v2260_v33  ;;  %v2289_v53 = vadd.f32 %v2281_v38, %v2261_v42 }
 0x2b5   : > { %v2292_v46 = vadd.f32 %v4965_v4, %v2264_v17  ;;  %v2298_v56 = vadd.f32 %v3417_v39, %v2285_v47  ;;  %v2299_v25 = vadd.f32 %v3417_v39, %v2286_v19  ;;  %v2300_v52 = vadd.f32 %v3417_v39, %v2287_v29 }
 0x2b6   : > { %v2206_v55 = vadd.f32 %v2198_v43, %v2178_v59  ;;  %v2262_v34 = vadd.f32 %v2254_v41, %v2234_v30  ;;  %v2301_v12 = vadd.f32 %v3417_v39, %v2288_v26  ;;  %v2302_v18 = vadd.f32 %v3417_v39, %v2289_v53 }
 0x2b7   : > { %v5107_v35 = vadd.f32 %v3417_v39, %v2292_v46  ;;  %v3418_v32 = vmul.f32 -1.442695, %v2298_v56  ;;  %v3419_v44 = vmul.f32 -1.442695, %v2299_v25  ;;  %v3420_v49 = vmul.f32 -1.442695, %v2300_v52 }
 0x2b8   : > { %v2235_v2 = vadd.f32 %v2227_v57, %v2206_v55  ;;  %v2290_v16 = vadd.f32 %v2282_v14, %v2262_v34  ;;  %v3421_v3 = vmul.f32 -1.442695, %v2301_v12  ;;  %v3422_v8 = vmul.f32 -1.442695, %v2302_v18 }
 0x2b9   : > { %4274 = vpow2.f32 %v3418_v32  ;;  %v2283_v4 = vmul.f32 %v4948_v60, %v5059_v6  ;;  %v3425_v11 = vmul.f32 -1.442695, %v5107_v35  ;;  %v4178_v32 = vld [vmem:[%s5294_s2 + $0xb8] sm:$0xff]  }
 0x2ba   : > { %v2263_v45 = vadd.f32 %v2255_v24, %v2235_v2  ;;  %v2303_v48 = vadd.f32 %v3417_v39, %v2290_v16  ;;  %4276 = vpow2.f32 %v3419_v44  ;;  %3993 = vmatpush3.bf16.msra.mxu1 %v4178_v32  ;;  %v4179_v44 = vld [vmem:[%s5294_s2 + $0xb0] sm:$0xff]   ;;  %v4180_v2 = vld [vmem:[%s5294_s2 + $0xa8] sm:$0xff]   ;;  %v4181_v16 = vld [vmem:[%s5294_s2 + $0xa0] sm:$0xff]  }
 0x2bb   : > { %4278 = vpow2.f32 %v3420_v49  ;;  %v4182_v49 = vld [vmem:[%s5294_s2 + $0x98] sm:$0xff]  }
 0x2bc   : > { %v2291_v43 = vadd.f32 %v2283_v4, %v2263_v45  ;;  %4280 = vpow2.f32 %v3421_v3  ;;  %v3423_v7 = vmul.f32 -1.442695, %v2303_v48  ;;  %v4183_v3 = vld [vmem:[%s5294_s2 + $0x90] sm:$0xff]   ;;  %v4185_v45 = vld [vmem:[%s5294_s2 + $0x80] sm:$0xff]  }
 0x2bd   : > { %4282 = vpow2.f32 %v3422_v8  ;;  %v4184_v8 = vld [vmem:[%s5294_s2 + $0x88] sm:$0xff]   ;;  %v2394_v4 = vld [vmem:[%s5296_s4 + $0x3] sm:$0x1] }
 0x2be   : > { %v2304_v15 = vadd.f32 %v3417_v39, %v2291_v43  ;;  %4284 = vpow2.f32 %v3423_v7 }
 0x2bf   : > { %4286 = vpow2.f32 %v3425_v11 }
 0x2c0   : > { %v3424_v57 = vmul.f32 -1.442695, %v2304_v15 }
 0x2c2   : > { %4288 = vpow2.f32 %v3424_v57 }
 0x2c6   : > { %v4275_v63 = vpop.eup %4274 }
 0x2c7   : > { %v4277_v23 = vpop.eup %4276  ;;  %v2330_v1 = vadd.f32 1.0, %v4275_v63 }
 0x2c8   : > { %v4279_v13 = vpop.eup %4278  ;;  %v2331_v62 = vadd.f32 1.0, %v4277_v23 }
 0x2c9   : > { %v4281_v60 = vpop.eup %4280  ;;  %v2332_v6 = vadd.f32 1.0, %v4279_v13  ;;  %4290 = vrcp.f32 %v2330_v1 }
 0x2ca   : > { %v4283_v20 = vpop.eup %4282  ;;  %v2333_v50 = vadd.f32 1.0, %v4281_v60  ;;  %4292 = vrcp.f32 %v2331_v62  ;;  %v4186_v60 = vld [vmem:[%s5294_s2 + $0xf8] sm:$0xff]  }
 0x2cb   : > { %v4285_v9 = vpop.eup %4284  ;;  %v2334_v0 = vadd.f32 1.0, %v4283_v20  ;;  %4294 = vrcp.f32 %v2332_v6  ;;  %4012 = vmatprep.subr.bf16.mxu0 %v4186_v60  ;;  %v4187_v6 = vld [vmem:[%s5294_s2 + $0xf0] sm:$0xff]   ;;  %v4188_v20 = vld [vmem:[%s5294_s2 + $0xe8] sm:$0xff]  }
 0x2cc   : > { %v2335_v41 = vadd.f32 1.0, %v4285_v9  ;;  %4296 = vrcp.f32 %v2333_v50  ;;  %v4287_v24 = vpop.eup %4286  ;;  %v4189_v50 = vld [vmem:[%s5294_s2 + $0xe0] sm:$0xff]   ;;  %v4190_v9 = vld [vmem:[%s5294_s2 + $0xd8] sm:$0xff]  }
 0x2cd   : > { %4298 = vrcp.f32 %v2334_v0  ;;  %v2337_v21 = vadd.f32 1.0, %v4287_v24  ;;  %v4191_v0 = vld [vmem:[%s5294_s2 + $0xd0] sm:$0xff]   ;;  %v4193_v24 = vld [vmem:[%s5294_s2 + $0xc0] sm:$0xff]  }
 0x2ce   : > { %4300 = vrcp.f32 %v2335_v41  ;;  %v4192_v41 = vld [vmem:[%s5294_s2 + $0xc8] sm:$0xff]  }
 0x2cf   : > { %v4289_v22 = vpop.eup %4288 }
 0x2d0   : > { %v2336_v40 = vadd.f32 1.0, %v4289_v22  ;;  %v4194_v22 = vld [vmem:[%s5294_s2 + $0x138] sm:$0xff]  }
 0x2d2   : > { %4302 = vrcp.f32 %v2336_v40  ;;  %v4195_v40 = vld [vmem:[%s5294_s2 + $0x130] sm:$0xff]  }
 0x2d3   : > { %4304 = vrcp.f32 %v2337_v21  ;;  %v4196_v21 = vld [vmem:[%s5294_s2 + $0x128] sm:$0xff]  }
 0x2d6   : > { %v4291_v37 = vpop.eup %4290 }
 0x2d7   : > { %v4293_v28 = vpop.eup %4292  ;;  %v5112_v54 = vmul.f32 %v4291_v37, %v2298_v56  ;;  %v4197_v37 = vld [vmem:[%s5294_s2 + $0x120] sm:$0xff]  }
 0x2d8   : > { %v4295_v31 = vpop.eup %4294  ;;  %v5114_v33 = vmul.f32 %v4293_v28, %v2299_v25  ;;  %v4198_v28 = vld [vmem:[%s5294_s2 + $0x118] sm:$0xff]  }
 0x2d9   : > { %v4297_v42 = vpop.eup %4296  ;;  %v5116_v17 = vmul.f32 %v4295_v31, %v2300_v52  ;;  %v2508_v31 = vld [vmem:[%s5296_s4 + $0x4] sm:$0x1] }
 0x2da   : > { %v2362_v10 = vadd.f32 %v5114_v33, %v5112_v54  ;;  %v4299_v61 = vpop.eup %4298  ;;  %v5120_v58 = vmul.f32 %v4297_v42, %v2301_v12 }
 0x2db   : > { %v4301_v51 = vpop.eup %4300  ;;  %v5123_v27 = vmul.f32 %v4299_v61, %v2302_v18 }
 0x2dc   : > { %v2363_v36 = vadd.f32 %v2362_v10, %v5116_v17  ;;  %v5126_v14 = vmul.f32 %v4301_v51, %v2303_v48 }
 0x2de   : > { %v2364_v39 = vadd.f32 %v2363_v36, %v5120_v58 }
 0x2df   : > { %v4303_v38 = vpop.eup %4302 }
 0x2e0   : > { %v5128_v47 = vmul.f32 %v4303_v38, %v2304_v15  ;;  %v2365_v19 = vadd.f32 %v2364_v39, %v5123_v27  ;;  %v4305_v59 = vpop.eup %4304 }
 0x2e1   : > { %v5133_v29 = vmul.f32 %v4305_v59, %v5107_v35  ;;  %v5140_v35 = vld [vmem:[#allocation2] sm:$0xff] }
 0x2e2   : > { %v2366_v30 = vadd.f32 %v2365_v19, %v5126_v14  ;;  %3994 = vmatprep.subr.bf16.mxu1 %v5140_v35 }
 0x2e3   : > { %3995 = vmatpush3.bf16.msra.mxu1 %v4179_v44 }
 0x2e4   : > { %v2367_v26 = vadd.f32 %v2366_v30, %v5128_v47  ;;  %3996 = vmatprep.subr.bf16.mxu1 %v5140_v35 }
 0x2e6   : > { %v2368_v53 = vadd.f32 %v2367_v26, %v5133_v29 }
 0x2e7   : > { %3997 = vmatpush3.bf16.msra.mxu1 %v4180_v2 }
 0x2e8   : > { %v2369_v46 = vrot.slane %v2368_v53, 4  ;;  %3998 = vmatprep.subr.bf16.mxu1 %v5140_v35 }
 0x2ea   : > { %v2370_v56 = vadd.f32 %v2369_v46, %v2368_v53 }
 0x2eb   : > { %3999 = vmatpush3.bf16.msra.mxu1 %v4181_v16 }
 0x2ec   : > { %v2371_v25 = vrot.slane %v2370_v56, 2  ;;  %4000 = vmatprep.subr.bf16.mxu1 %v5140_v35 }
 0x2ee   : > { %v2372_v55 = vadd.f32 %v2371_v25, %v2370_v56 }
 0x2ef   : > { %4001 = vmatpush3.bf16.msra.mxu1 %v4182_v49 }
 0x2f0   : > { %v2373_v34 = vrot.slane %v2372_v55, 1  ;;  %4002 = vmatprep.subr.bf16.mxu1 %v5140_v35 }
 0x2f2   : > { %v2374_v52 = vadd.f32 %v2373_v34, %v2372_v55 }
 0x2f3   : > { %4003 = vmatpush3.bf16.msra.mxu1 %v4183_v3 }
 0x2f4   : > { %v2375_v12 = vmul.f32 0.015625, %v2374_v52  ;;  %4004 = vmatprep.subr.bf16.mxu1 %v5140_v35 }
 0x2f6   : > { %v2376_v18 = vpack.c.bf16 %v2375_v12, %v2375_v12 }
 0x2f7   : > { %4005 = vmatpush3.bf16.msra.mxu1 %v4184_v8  ;;  %v5325_v8 = vld [vmem:[#allocation5_spill] sm:$0xff] }
 0x2f8   : > { %3989 = vmatmul.mubr.bf16.vlgmr.msra.gmra.mxu0 %v2376_v18  ;;  %4006 = vmatprep.subr.bf16.mxu1 %v5140_v35 }
 0x2f9   : > { %4013 = vmatpush3.bf16.msra.mxu0 %v4186_v60 }
 0x2fa   : > { %4014 = vmatprep.subr.bf16.mxu0 %v4187_v6 }
 0x2fb   : > { %4007 = vmatpush3.bf16.msra.mxu1 %v4185_v45 }
 0x2fc   : > { %4036 = vmatprep.subr.bf16.mxu1 %v4194_v22 }
 0x2fd   : > { %4015 = vmatpush3.bf16.msra.mxu0 %v4187_v6 }
 0x2fe   : > { %4016 = vmatprep.subr.bf16.mxu0 %v4188_v20 }
 0x301   : > { %4017 = vmatpush3.bf16.msra.mxu0 %v4188_v20 }
 0x302   : > { %4018 = vmatprep.subr.bf16.mxu0 %v4189_v50 }
 0x305   : > { %4019 = vmatpush3.bf16.msra.mxu0 %v4189_v50 }
 0x306   : > { %4020 = vmatprep.subr.bf16.mxu0 %v4190_v9 }
 0x309   : > { %4021 = vmatpush3.bf16.msra.mxu0 %v4190_v9  ;;  %v5329_v9 = vld [vmem:[#allocation9_spill] sm:$0xff] }
 0x30a   : > { %4022 = vmatprep.subr.bf16.mxu0 %v4191_v0 }
 0x30d   : > { %4023 = vmatpush3.bf16.msra.mxu0 %v4191_v0 }
 0x30e   : > { %4024 = vmatprep.subr.bf16.mxu0 %v4192_v41 }
 0x311   : > { %4025 = vmatpush3.bf16.msra.mxu0 %v4192_v41  ;;  %v5330_v41 = vld [vmem:[#allocation10_spill] sm:$0xff] }
 0x312   : > { %4026 = vmatprep.subr.bf16.mxu0 %v4193_v24 }
 0x315   : > { %4027 = vmatpush3.bf16.msra.mxu0 %v4193_v24 }
 0x316   : > { %4060 = vmatprep.subr.bf16.mxu0 %v5140_v35 }
 0x3b8   : > { %v2477_v48 = vpop.f32.mrf.mxu0 }
 0x3b9   : > { %v2478_v43 = vadd.f32 %v2477_v48, %v2394_v4  ;;  %v5326_v48 = vld [vmem:[#allocation6_spill] sm:$0xff] }
 0x3ba   : > { %v3990_v7 = vpop.f32.mrf.mxu0 }
 0x3bb   : > { %v3450_v11 = vmul.f32 -1.442695, %v2478_v43  ;;  %v5327_v7 = vld [vmem:[#allocation7_spill] sm:$0xff] }
 0x3bc   : > { %v2480_v15 = vpop.f32.mrf.mxu0 }
 0x3bd   : > { %4306 = vpow2.f32 %v3450_v11  ;;  %v5328_v15 = vld [vmem:[#allocation8_spill] sm:$0xff] }
 0x3be   : > { %v3991_v57 = vpop.f32.mrf.mxu0 }
 0x3ca   : > { %v4307_v63 = vpop.eup %4306 }
 0x3cb   : > { %v2486_v23 = vadd.f32 1.0, %v4307_v63 }
 0x3cd   : > { %4308 = vrcp.f32 %v2486_v23 }
 0x3da   : > { %v4309_v1 = vpop.eup %4308 }
 0x3db   : > { %v2489_v13 = vmul.f32 %v4309_v1, %v2478_v43 }
 0x3dd   : > { %v2490_v62 = vpack.c.bf16 %v2489_v13, %v2489_v13 }
 0x3df   : > { %4009 = vmatmul.mubr.bf16.vlgmr.msra.gmra.mxu1 %v2490_v62 }
 0x3e0   : > { %4037 = vmatpush3.bf16.msra.mxu1 %v4194_v22  ;;  %v5331_v22 = vld [vmem:[#allocation11_spill] sm:$0xff] }
 0x3e1   : > { %4038 = vmatprep.subr.bf16.mxu1 %v4195_v40 }
 0x3e4   : > { %4039 = vmatpush3.bf16.msra.mxu1 %v4195_v40 }
 0x3e5   : > { %4040 = vmatprep.subr.bf16.mxu1 %v4196_v21 }
 0x3e8   : > { %4041 = vmatpush3.bf16.msra.mxu1 %v4196_v21  ;;  %v5332_v21 = vld [vmem:[#allocation12_spill] sm:$0xff] }
 0x3e9   : > { %4042 = vmatprep.subr.bf16.mxu1 %v4197_v37 }
 0x3ec   : > { %4043 = vmatpush3.bf16.msra.mxu1 %v4197_v37 }
 0x3ed   : > { %4044 = vmatprep.subr.bf16.mxu1 %v4198_v28 }
 0x3f0   : > { %4045 = vmatpush3.bf16.msra.mxu1 %v4198_v28 }
 0x49f   : > { %v2591_v42 = vpop.f32.mrf.mxu1 }
 0x4a0   : > { %v2592_v10 = vadd.f32 %v2591_v42, %v2508_v31  ;;  %v4202_v42 = vld [vmem:[%s5294_s2 + $0x178] sm:$0xff]  }
 0x4a1   : > { %v4010_v61 = vpop.f32.mrf.mxu1 }
 0x4a2   : > { %v3475_v36 = vmul.f32 -1.442695, %v2592_v10  ;;  %v4203_v10 = vld [vmem:[%s5294_s2 + $0x170] sm:$0xff]   ;;  %v4204_v61 = vld [vmem:[%s5294_s2 + $0x168] sm:$0xff]  }
 0x4a3   : > { %v2594_v51 = vpop.f32.mrf.mxu1 }
 0x4a4   : > { %4310 = vpow2.f32 %v3475_v36  ;;  %v4205_v36 = vld [vmem:[%s5294_s2 + $0x160] sm:$0xff]   ;;  %v4206_v51 = vld [vmem:[%s5294_s2 + $0x158] sm:$0xff]  }
 0x4a5   : > { %v4011_v39 = vpop.f32.mrf.mxu1 }
 0x4a6   : > { %v4207_v39 = vld [vmem:[%s5294_s2 + $0x150] sm:$0xff]  }
 0x4b1   : > { %v4311_v38 = vpop.eup %4310 }
 0x4b2   : > { %v2600_v19 = vadd.f32 1.0, %v4311_v38  ;;  %v4208_v38 = vld [vmem:[%s5294_s2 + $0x148] sm:$0xff]  }
 0x4b4   : > { %4312 = vrcp.f32 %v2600_v19  ;;  %v4209_v19 = vld [vmem:[%s5294_s2 + $0x140] sm:$0xff]  }
 0x4c1   : > { %v4313_v59 = vpop.eup %4312 }
 0x4c2   : > { %v2606_v30 = vrot.slane %v4313_v59, %v4915_v5  ;;  %v3517_v59 = vld [vmem:[%s5296_s4 + $0x6] ss:$0 sm:$0xff] }
 0x4c4   : > { %v2607_v26 = vmul.f32 %v2606_v30, %v5112_v54  ;;  %v2608_v53 = vmul.f32 %v2606_v30, %v5114_v33  ;;  %v2609_v46 = vmul.f32 %v2606_v30, %v5116_v17  ;;  %v2610_v56 = vmul.f32 %v2606_v30, %v5120_v58  ;;  %v4199_v33 = vld [vmem:[%s5294_s2 + $0x110] sm:$0xff]   ;;  %v4200_v17 = vld [vmem:[%s5294_s2 + $0x108] sm:$0xff]   ;;  %v4201_v58 = vld [vmem:[%s5294_s2 + $0x100] sm:$0xff]  }
 0x4c5   : > { %v2611_v25 = vmul.f32 %v2606_v30, %v5123_v27  ;;  %v2612_v55 = vmul.f32 %v2606_v30, %v5126_v14  ;;  %v2613_v18 = vmul.f32 %v2606_v30, %v5128_v47  ;;  %v2614_v54 = vmul.f32 %v2606_v30, %v5133_v29  ;;  %4046 = vmatprep.subr.bf16.mxu1 %v4199_v33  ;;  %v3492_v47 = vld [vmem:[%s5296_s4 + $0x5] ss:$0 sm:$0xff] }
 0x4c6   : > { %v2615_v34 = vpack.c.bf16 %v2608_v53, %v2607_v26  ;;  %v2616_v52 = vpack.c.bf16 %v2610_v56, %v2609_v46  ;;  %4047 = vmatpush3.bf16.msra.mxu1 %v4199_v33 }
 0x4c7   : > { %v2617_v12 = vpack.c.bf16 %v2612_v55, %v2611_v25  ;;  %v2618_v32 = vpack.c.bf16 %v2614_v54, %v2613_v18  ;;  %4048 = vmatprep.subr.bf16.mxu1 %v4200_v17 }
 0x4c8   : > { %4028 = vmatprep.mubr.bf16.mxu0 %v2615_v34 }
 0x4c9   : > { %4029 = vmatmul.mubr.bf16.vlgmr.msra.gmra.mxu0 %v2616_v52 }
 0x4ca   : > { %4032 = vmatprep.mubr.bf16.mxu0 %v2617_v12  ;;  %4049 = vmatpush3.bf16.msra.mxu1 %v4200_v17 }
 0x4cb   : > { %4050 = vmatprep.subr.bf16.mxu1 %v4201_v58  ;;  %4061 = vmatpush3.bf16.msra.mxu0 %v4202_v42 }
 0x4cc   : > { %4062 = vmatprep.subr.bf16.mxu0 %v5140_v35 }
 0x4ce   : > { %4051 = vmatpush3.bf16.msra.mxu1 %v4201_v58 }
 0x4cf   : > { %4063 = vmatpush3.bf16.msra.mxu0 %v4203_v10 }
 0x4d0   : > { %4064 = vmatprep.subr.bf16.mxu0 %v5140_v35 }
 0x4d1   : > { %4033 = vmatmul.mubr.bf16.gmra.mxu0 %v2618_v32 }
 0x4d2   : > { %4076 = vmatprep.mubr.msk.bf16.mxu0 %vm4357_vm0, %v5140_v35 }
 0x4d3   : > { %4065 = vmatpush3.bf16.msra.mxu0 %v4204_v61 }
 0x4d4   : > { %4066 = vmatprep.subr.bf16.mxu0 %v5140_v35 }
 0x4d7   : > { %4067 = vmatpush3.bf16.msra.mxu0 %v4205_v36 }
 0x4d8   : > { %4068 = vmatprep.subr.bf16.mxu0 %v5140_v35 }
 0x4db   : > { %4069 = vmatpush3.bf16.msra.mxu0 %v4206_v51 }
 0x4dc   : > { %4070 = vmatprep.subr.bf16.mxu0 %v5140_v35 }
 0x4df   : > { %4071 = vmatpush3.bf16.msra.mxu0 %v4207_v39 }
 0x4e0   : > { %4072 = vmatprep.subr.bf16.mxu0 %v5140_v35 }
 0x4e3   : > { %4073 = vmatpush3.bf16.msra.mxu0 %v4208_v38 }
 0x4e4   : > { %4074 = vmatprep.subr.bf16.mxu0 %v5140_v35 }
 0x4e7   : > { %4075 = vmatpush3.bf16.msra.mxu0 %v4209_v19 }
 0x589   : > { %v4030_v27 = vpop.f32.mrf.mxu0 }
 0x58a   : > { %v2732_v16 = vadd.f32 %v4030_v27, %v3492_v47 }
 0x58b   : > { %v2723_v14 = vpop.f32.mrf.mxu0 }
 0x58c   : > { %v2724_v44 = vadd.f32 %v3492_v47, %v2723_v14  ;;  %v2756_v57 = vadd.f32 %v2732_v16, %v5328_v15 }
 0x58d   : > { %v4031_v29 = vpop.f32.mrf.mxu0 }
 0x58e   : > { %v2735_v2 = vadd.f32 %v4031_v29, %v3492_v47  ;;  %v2754_v43 = vadd.f32 %v2724_v44, %v5326_v48 }
 0x58f   : > { %v2726_v49 = vpop.f32.mrf.mxu0 }
 0x590   : > { %v2727_v3 = vadd.f32 %v3492_v47, %v2726_v49  ;;  %v2757_v45 = vadd.f32 %v2735_v2, %v5325_v8 }
 0x591   : > { %v4034_v4 = vpop.f32.mrf.mxu0 }
 0x592   : > { %v2755_v11 = vadd.f32 %v2727_v3, %v5327_v7  ;;  %v2763_v1 = vpack.c.bf16 %v2757_v45, %v2756_v57  ;;  %v2748_v6 = vadd.f32 %v4034_v4, %v3492_v47 }
 0x593   : > { %v2739_v63 = vpop.f32.mrf.mxu0 }
 0x594   : > { %v2762_v23 = vpack.c.bf16 %v2755_v11, %v2754_v43  ;;  %v2740_v62 = vadd.f32 %v3492_v47, %v2739_v63  ;;  %v2760_v37 = vadd.f32 %v2748_v6, %v5332_v21 }
 0x595   : > { %v4035_v13 = vpop.f32.mrf.mxu0 }
 0x596   : > { %v2751_v60 = vadd.f32 %v4035_v13, %v3492_v47  ;;  %4052 = vmatprep.mubr.bf16.mxu1 %v2762_v23  ;;  %v2758_v24 = vadd.f32 %v2740_v62, %v5330_v41 }
 0x597   : > { %v2742_v20 = vpop.f32.mrf.mxu0  ;;  %4053 = vmatmul.mubr.bf16.vlgmr.msra.gmra.mxu1 %v2763_v1 }
 0x598   : > { %v2743_v50 = vadd.f32 %v3492_v47, %v2742_v20  ;;  %v2761_v0 = vadd.f32 %v2751_v60, %v5329_v9 }
 0x59a   : > { %v2759_v40 = vadd.f32 %v2743_v50, %v5331_v22  ;;  %v2765_v31 = vpack.c.bf16 %v2761_v0, %v2760_v37 }
 0x59c   : > { %v2764_v28 = vpack.c.bf16 %v2759_v40, %v2758_v24 }
 0x59e   : > { %4056 = vmatprep.mubr.bf16.mxu1 %v2764_v28 }
 0x59f   : > { %4057 = vmatmul.mubr.bf16.gmra.mxu1 %v2765_v31 }
 0x657   : > { %v4054_v30 = vpop.f32.mrf.mxu1 }
 0x658   : > { %v2879_v26 = vadd.f32 %v4054_v30, %v3517_v59 }
 0x659   : > { %v2870_v53 = vpop.f32.mrf.mxu1 }
 0x65a   : > { %v3528_v46 = vmul.f32 -1.442695, %v2879_v26  ;;  %v2871_v56 = vadd.f32 %v3517_v59, %v2870_v53 }
 0x65b   : > { %v4055_v25 = vpop.f32.mrf.mxu1 }
 0x65c   : > { %v3526_v55 = vmul.f32 -1.442695, %v2871_v56  ;;  %v2882_v34 = vadd.f32 %v4055_v25, %v3517_v59  ;;  %4314 = vpow2.f32 %v3528_v46 }
 0x65d   : > { %v2873_v52 = vpop.f32.mrf.mxu1 }
 0x65e   : > { %4316 = vpow2.f32 %v3526_v55  ;;  %v3529_v12 = vmul.f32 -1.442695, %v2882_v34  ;;  %v2874_v18 = vadd.f32 %v3517_v59, %v2873_v52  ;;  %v2989_v52 = vld [vmem:[%s5296_s4 + $0x7] sm:$0x1] }
 0x65f   : > { %v4058_v54 = vpop.f32.mrf.mxu1 }
 0x660   : > { %4318 = vpow2.f32 %v3529_v12  ;;  %v3527_v35 = vmul.f32 -1.442695, %v2874_v18  ;;  %v2895_v32 = vadd.f32 %v4058_v54, %v3517_v59 }
 0x661   : > { %v2886_v33 = vpop.f32.mrf.mxu1 }
 0x662   : > { %4320 = vpow2.f32 %v3527_v35  ;;  %v3532_v17 = vmul.f32 -1.442695, %v2895_v32  ;;  %v2887_v58 = vadd.f32 %v3517_v59, %v2886_v33 }
 0x663   : > { %v4059_v27 = vpop.f32.mrf.mxu1 }
 0x664   : > { %v3530_v14 = vmul.f32 -1.442695, %v2887_v58  ;;  %v2898_v47 = vadd.f32 %v4059_v27, %v3517_v59  ;;  %4322 = vpow2.f32 %v3532_v17 }
 0x665   : > { %v2889_v29 = vpop.f32.mrf.mxu1 }
 0x666   : > { %4324 = vpow2.f32 %v3530_v14  ;;  %v3533_v44 = vmul.f32 -1.442695, %v2898_v47  ;;  %v2890_v2 = vadd.f32 %v3517_v59, %v2889_v29 }
 0x668   : > { %4326 = vpow2.f32 %v3533_v44  ;;  %v3531_v16 = vmul.f32 -1.442695, %v2890_v2 }
 0x669   : > { %v4315_v49 = vpop.eup %4314 }
 0x66a   : > { %4328 = vpow2.f32 %v3531_v16  ;;  %v2927_v4 = vadd.f32 1.0, %v4315_v49 }
 0x66b   : > { %v4317_v3 = vpop.eup %4316 }
 0x66c   : > { %v2925_v8 = vadd.f32 1.0, %v4317_v3 }
 0x66d   : > { %v4319_v45 = vpop.eup %4318 }
 0x66e   : > { %4330 = vrcp.f32 %v2925_v8  ;;  %v2928_v43 = vadd.f32 1.0, %v4319_v45 }
 0x66f   : > { %v4321_v48 = vpop.eup %4320  ;;  %4332 = vrcp.f32 %v2927_v4 }
 0x670   : > { %v2926_v7 = vadd.f32 1.0, %v4321_v48 }
 0x671   : > { %v4323_v11 = vpop.eup %4322 }
 0x672   : > { %4334 = vrcp.f32 %v2926_v7  ;;  %v2931_v23 = vadd.f32 1.0, %v4323_v11 }
 0x673   : > { %v4325_v15 = vpop.eup %4324  ;;  %4336 = vrcp.f32 %v2928_v43 }
 0x674   : > { %v2929_v57 = vadd.f32 1.0, %v4325_v15 }
 0x675   : > { %v4327_v63 = vpop.eup %4326 }
 0x676   : > { %4338 = vrcp.f32 %v2929_v57  ;;  %v2932_v13 = vadd.f32 1.0, %v4327_v63 }
 0x677   : > { %v4329_v1 = vpop.eup %4328  ;;  %4340 = vrcp.f32 %v2931_v23 }
 0x678   : > { %v2930_v62 = vadd.f32 1.0, %v4329_v1 }
 0x67a   : > { %4342 = vrcp.f32 %v2930_v62 }
 0x67b   : > { %4344 = vrcp.f32 %v2932_v13  ;;  %v4331_v60 = vpop.eup %4330 }
 0x67c   : > { %v4333_v6 = vpop.eup %4332  ;;  %v2949_v50 = vmul.f32 %v4331_v60, %v2871_v56 }
 0x67d   : > { %v2951_v41 = vmul.f32 %v4333_v6, %v2879_v26 }
 0x67f   : > { %v4335_v20 = vpop.eup %4334 }
 0x680   : > { %v2950_v9 = vmul.f32 %v4335_v20, %v2874_v18  ;;  %v4337_v0 = vpop.eup %4336 }
 0x681   : > { %v2952_v40 = vmul.f32 %v4337_v0, %v2882_v34 }
 0x682   : > { %v2957_v24 = vadd.f32 %v2950_v9, %v2949_v50 }
 0x683   : > { %v4339_v22 = vpop.eup %4338 }
 0x684   : > { %v2958_v21 = vadd.f32 %v2957_v24, %v2951_v41  ;;  %v4341_v37 = vpop.eup %4340  ;;  %v2953_v28 = vmul.f32 %v4339_v22, %v2887_v58 }
 0x685   : > { %v2955_v51 = vmul.f32 %v4341_v37, %v2895_v32 }
 0x686   : > { %v2959_v31 = vadd.f32 %v2958_v21, %v2952_v40 }
 0x687   : > { %v4343_v42 = vpop.eup %4342 }
 0x688   : > { %v2960_v10 = vadd.f32 %v2959_v31, %v2953_v28  ;;  %v2954_v61 = vmul.f32 %v4343_v42, %v2890_v2  ;;  %v4345_v36 = vpop.eup %4344 }
 0x689   : > { %v2956_v38 = vmul.f32 %v4345_v36, %v2898_v47 }
 0x68a   : > { %v2961_v39 = vadd.f32 %v2960_v10, %v2954_v61 }
 0x68c   : > { %v2962_v19 = vadd.f32 %v2961_v39, %v2955_v51 }
 0x68e   : > { %v2963_v59 = vadd.f32 %v2962_v19, %v2956_v38 }
 0x690   : > { %v2964_v30 = vrot.slane %v2963_v59, 4 }
 0x692   : > { %v2965_v53 = vadd.f32 %v2964_v30, %v2963_v59 }
 0x694   : > { %v2966_v26 = vrot.slane %v2965_v53, 2 }
 0x696   : > { %v2967_v46 = vadd.f32 %v2966_v26, %v2965_v53 }
 0x698   : > { %v2968_v56 = vrot.slane %v2967_v46, 1 }
 0x69a   : > { %v2969_v25 = vadd.f32 %v2968_v56, %v2967_v46 }
 0x69c   : > { %v2970_v55 = vmul.f32 0.015625, %v2969_v25 }
 0x69e   : > { %v2971_v34 = vpack.c.bf16 %v2970_v55, %v2970_v55 }
 0x6a0   : > { %4077 = vmatmul.mubr.bf16.vlgmr.msra.gmra.mxu0 %v2971_v34 }
 0x760   : > { %v3072_v12 = vpop.f32.mrf.mxu0 }
 0x761   : > { %v3073_v18 = vadd.f32 %v3072_v12, %v2989_v52 }
 0x762   : > { %v4078_v54 = vpop.f32.mrf.mxu0 }
 0x763   : > { %v3081_v35 = vrot.slane %v3073_v18, %v4915_v5 }
 0x764   : > { %v3075_v32 = vpop.f32.mrf.mxu0 }
 0x765   : > { %3082 = vst [vmem:[%s222_s13] sm:$0xff] %v3081_v35 }
 0x766   : > { %v4079_v33 = vpop.f32.mrf.mxu0 }
 0x767 PF: > { %s15_s18 = sadd.s32 1, %s4354_s18  }
 0x768   : > { %p12_p4 = scmp.ge.s32.totalorder %s15_s18, 4  }
 0x76a   :  { %14 = sbr.rel (!%p12_p4) target bundleno = 1 (0x1), region = 156 }

</bundles_post_ra>
